<compile_context>
chip_gen: v7x
topology: tpu7x:2x2x1
jax: 0.10.0
libtpu: 0.0.40
codegen_flags: <defaults>
</compile_context>

<pallas_src>
import jax
import jax.numpy as jnp
from jax import lax
from jax.experimental import pallas as pl
from jax.experimental.pallas import tpu as pltpu


# ------------------------------------------------------------------ kernel ---
def _lstm_gen_kernel(x_ref, h0_ref, c0_ref,
                     wih0_ref, whh0_ref, b0_ref,
                     wih1_ref, whh1_ref, b1_ref,
                     h1_ref,
                     xw0_sc):
    H = whh0_ref.shape[0]
    B_pad = h0_ref.shape[1]
    T = x_ref.shape[0] // B_pad

    # Weights / biases loaded once; they stay resident in vregs for the loop.
    wih0 = wih0_ref[...]      # (1, 4H)  (i/f/o columns pre-scaled by 0.5)
    whh0 = whh0_ref[...]      # (H, 4H)
    b0 = b0_ref[...]          # (1, 4H)
    wih1 = wih1_ref[...]      # (H, 4H)
    whh1 = whh1_ref[...]      # (H, 4H)
    b1 = b1_ref[...]          # (1, 4H)

    # Hoisted layer-0 input contribution: one parallel VPU pass over the whole
    # sequence (off the serial critical path).  input_size == 1, so x @ W_ih
    # is just a broadcast multiply.
    xw0_sc[...] = x_ref[...] * wih0 + b0              # (T*B_pad, 4H)

    def step(t, carry):
        h0p, c0p, h1p, c1p = carry
        row = pl.multiple_of(t * B_pad, B_pad)
        xw0 = xw0_sc[pl.ds(row, B_pad), :]            # (B_pad, 4H) lane-dense

        # Layer-1 hidden term depends only on the previous step -> its MXU
        # push can overlap with layer-0 compute.
        g1h = jnp.dot(h1p, whh1, preferred_element_type=jnp.float32) + b1

        # --- layer 0 -----------------------------------------------------
        gates0 = jnp.dot(h0p, whh0, preferred_element_type=jnp.float32) + xw0
        t0 = jnp.tanh(gates0)                         # single EUP pass (4H)
        # sigmoid(z) = 0.5*tanh(z/2) + 0.5 ; i/f/o columns were pre-scaled
        # by 0.5 in the wrapper, the g column was not.
        i0 = 0.5 * t0[:, 0:H] + 0.5
        f0 = 0.5 * t0[:, H:2 * H] + 0.5
        g0 = t0[:, 2 * H:3 * H]
        o0 = 0.5 * t0[:, 3 * H:4 * H] + 0.5
        c0n = f0 * c0p + i0 * g0
        h0n = o0 * jnp.tanh(c0n)

        # --- layer 1 -----------------------------------------------------
        gates1 = g1h + jnp.dot(h0n, wih1, preferred_element_type=jnp.float32)
        t1 = jnp.tanh(gates1)
        i1 = 0.5 * t1[:, 0:H] + 0.5
        f1 = 0.5 * t1[:, H:2 * H] + 0.5
        g1 = t1[:, 2 * H:3 * H]
        o1 = 0.5 * t1[:, 3 * H:4 * H] + 0.5
        c1n = f1 * c1p + i1 * g1
        h1n = o1 * jnp.tanh(c1n)

        # Stage this step's h1; the Linear(H,1) projection happens in XLA.
        h1_ref[pl.ds(row, B_pad), :] = h1n
        return (h0n, c0n, h1n, c1n)

    init = (h0_ref[0], c0_ref[0], h0_ref[1], c0_ref[1])
    lax.fori_loop(0, T, step, init, unroll=min(T, 8))


# ----------------------------------------------------------------- wrapper ---
def _prescale_gates(w, H):
    """Scale the i/f/o gate columns by 0.5 (sigmoid-via-tanh trick)."""
    scale = jnp.concatenate([
        jnp.full((2 * H,), 0.5, jnp.float32),    # i, f
        jnp.ones((H,), jnp.float32),             # g (tanh gate, unscaled)
        jnp.full((H,), 0.5, jnp.float32),        # o
    ])
    return (w * scale[None, :]).astype(jnp.float32)


def generator_forward(x, h0, c0, params):
    """x: (B, T) or (B, T, 1) float32.  Returns (B, T, 1) like the PyTorch module."""
    (wih0, whh0, b0, wih1, whh1, b1, wout, bout) = params
    H = whh0.shape[0]
    F = wih0.shape[0]
    B = h0.shape[1]
    x = x.reshape(B, -1, F)                      # x.view(batch, seq, 1)
    T = x.shape[1]

    # Pad batch to the sublane quantum (8) so every per-step tile is unmasked.
    # TODO(synk): for B_pad >= 16 on v7x, add a batch-chunk grid axis with
    # dimension_semantics=("parallel",) so both TensorCores are used.
    B_pad = ((B + 7) // 8) * 8
    pad_b = B_pad - B

    x_tm = jnp.transpose(x, (1, 0, 2))                      # (T, B, F)
    x_tm = jnp.pad(x_tm, ((0, 0), (0, pad_b), (0, 0)))      # (T, B_pad, F)
    x_flat = x_tm.reshape(T * B_pad, F)                     # (T*B_pad, F)

    h0_p = jnp.pad(h0, ((0, 0), (0, pad_b), (0, 0)))        # (2, B_pad, H)
    c0_p = jnp.pad(c0, ((0, 0), (0, pad_b), (0, 0)))

    # Pre-scale i/f/o columns of the gate weights/biases (see kernel).
    wih0_s = _prescale_gates(wih0, H)
    whh0_s = _prescale_gates(whh0, H)
    b0_s = _prescale_gates(b0, H)
    wih1_s = _prescale_gates(wih1, H)
    whh1_s = _prescale_gates(whh1, H)
    b1_s = _prescale_gates(b1, H)

    vmem = pl.BlockSpec(memory_space=pltpu.MemorySpace.VMEM)

    h1_flat = pl.pallas_call(
        _lstm_gen_kernel,
        out_shape=jax.ShapeDtypeStruct((T * B_pad, H), jnp.float32),
        in_specs=[
            vmem,   # x        (T*B_pad, F)
            vmem,   # h0       (2, B_pad, H)
            vmem,   # c0       (2, B_pad, H)
            vmem,   # W_ih_l0^T (F, 4H)
            vmem,   # W_hh_l0^T (H, 4H)
            vmem,   # b_l0      (1, 4H)
            vmem,   # W_ih_l1^T (H, 4H)
            vmem,   # W_hh_l1^T (H, 4H)
            vmem,   # b_l1      (1, 4H)
        ],
        out_specs=vmem,
        scratch_shapes=[
            pltpu.VMEM((T * B_pad, 4 * H), jnp.float32),    # hoisted x*W_ih+b
        ],
    )(x_flat, h0_p, c0_p, wih0_s, whh0_s, b0_s, wih1_s, whh1_s, b1_s)

    # Deferred output Linear(H, 1): N=1 is <1% of the MXU and would force a
    # width-1 masked store in the kernel; it fuses for free in XLA here.
    y_flat = h1_flat @ wout + bout.reshape(1, 1)
    y = y_flat.reshape(T, B_pad, 1)[:, :B, :]               # drop batch padding
    return jnp.transpose(y, (1, 0, 2))                      # back to (B, T, 1)


# ------------------------------------------------------- pure-JAX reference ---
def generator_reference(x, h0, c0, params):
    (wih0, whh0, b0, wih1, whh1, b1, wout, bout) = params
    H = whh0.shape[0]
    F = wih0.shape[0]
    B = h0.shape[1]
    x = x.reshape(B, -1, F)
    x_tm = jnp.transpose(x, (1, 0, 2))

    def cell(inp, h_prev, c_prev, wih, whh, b):
        gates = inp @ wih + h_prev @ whh + b
        i = jax.nn.sigmoid(gates[:, 0 * H:1 * H])
        f = jax.nn.sigmoid(gates[:, 1 * H:2 * H])
        g = jnp.tanh(gates[:, 2 * H:3 * H])
        o = jax.nn.sigmoid(gates[:, 3 * H:4 * H])
        c_new = f * c_prev + i * g
        return o * jnp.tanh(c_new), c_new

    def step(carry, x_t):
        (h0_, c0_, h1_, c1_) = carry
        h0n, c0n = cell(x_t, h0_, c0_, wih0, whh0, b0)
        h1n, c1n = cell(h0n, h1_, c1_, wih1, whh1, b1)
        y = h1n @ wout + bout
        return (h0n, c0n, h1n, c1n), y

    init = (h0[0], c0[0], h0[1], c0[1])
    _, ys = lax.scan(step, init, x_tm)
    return jnp.transpose(ys, (1, 0, 2))


# -------------------------------------------------------------------- main ---
if __name__ == "__main__":
    # Small shapes consistent with the module's forward pass.
    B = 2           # batch_size
    T = 8           # seq_length
    F = 1           # n_features
    H = 32          # hidden_dim
    NUM_LAYERS = 2

    key = jax.random.PRNGKey(0)
    keys = jax.random.split(key, 10)
    bound = 1.0 / jnp.sqrt(H)   # PyTorch LSTM/Linear default init range

    def u(k, shape):
        return jax.random.uniform(k, shape, jnp.float32, -bound, bound)

    # Weights pre-transposed to (in, 4H) / (in, out) layout for `x @ W`.
    wih0 = u(keys[0], (F, 4 * H))
    whh0 = u(keys[1], (H, 4 * H))
    b0   = u(keys[2], (1, 4 * H)) + u(keys[3], (1, 4 * H))   # b_ih_l0 + b_hh_l0
    wih1 = u(keys[4], (H, 4 * H))
    whh1 = u(keys[5], (H, 4 * H))
    b1   = u(keys[6], (1, 4 * H)) + u(keys[7], (1, 4 * H))   # b_ih_l1 + b_hh_l1
    wout = u(keys[8], (H, 1))
    bout = u(keys[9], (1, 1))
    params = (wih0, whh0, b0, wih1, whh1, b1, wout, bout)

    # Example input and init_hidden() (zeros), as the PyTorch module would use.
    x = jax.random.normal(jax.random.PRNGKey(42), (B, T), jnp.float32)
    h0 = jnp.zeros((NUM_LAYERS, B, H), jnp.float32)
    c0 = jnp.zeros((NUM_LAYERS, B, H), jnp.float32)

    y = generator_forward(x, h0, c0, params)
    y = jax.block_until_ready(y)

    y_ref = generator_reference(x, h0, c0, params)
    assert y.shape == (B, T, 1), y.shape
    assert jnp.allclose(y, y_ref, atol=1e-5, rtol=1e-5), \
        f"max abs err = {jnp.max(jnp.abs(y - y_ref))}"

    print("KERNEL_OK")
</pallas_src>

<mosaic_0001>
module attributes {stable_mosaic.version = 11 : i64} {
  func.func @_lstm_gen_kernel(%arg0: memref<64x1xf32, #tpu.memory_space<vmem>>, %arg1: memref<2x8x32xf32, #tpu.memory_space<vmem>>, %arg2: memref<2x8x32xf32, #tpu.memory_space<vmem>>, %arg3: memref<1x128xf32, #tpu.memory_space<vmem>>, %arg4: memref<32x128xf32, #tpu.memory_space<vmem>>, %arg5: memref<1x128xf32, #tpu.memory_space<vmem>>, %arg6: memref<32x128xf32, #tpu.memory_space<vmem>>, %arg7: memref<32x128xf32, #tpu.memory_space<vmem>>, %arg8: memref<1x128xf32, #tpu.memory_space<vmem>>, %arg9: memref<64x32xf32, #tpu.memory_space<vmem>>, %arg10: memref<64x128xf32, #tpu.memory_space<vmem>>) attributes {dimension_semantics = [], scalar_prefetch = 0 : i64, scratch_operands = 1 : i64, tpu.core_type = #tpu.core_type<tc>} {
    %c0 = arith.constant 0 : index
    %c0_0 = arith.constant 0 : index
    %0 = vector.load %arg3[%c0, %c0_0] : memref<1x128xf32, #tpu.memory_space<vmem>>, vector<1x128xf32>
    %c0_1 = arith.constant 0 : index
    %c0_2 = arith.constant 0 : index
    %1 = vector.load %arg4[%c0_1, %c0_2] : memref<32x128xf32, #tpu.memory_space<vmem>>, vector<32x128xf32>
    %c0_3 = arith.constant 0 : index
    %c0_4 = arith.constant 0 : index
    %2 = vector.load %arg5[%c0_3, %c0_4] : memref<1x128xf32, #tpu.memory_space<vmem>>, vector<1x128xf32>
    %c0_5 = arith.constant 0 : index
    %c0_6 = arith.constant 0 : index
    %3 = vector.load %arg6[%c0_5, %c0_6] : memref<32x128xf32, #tpu.memory_space<vmem>>, vector<32x128xf32>
    %c0_7 = arith.constant 0 : index
    %c0_8 = arith.constant 0 : index
    %4 = vector.load %arg7[%c0_7, %c0_8] : memref<32x128xf32, #tpu.memory_space<vmem>>, vector<32x128xf32>
    %c0_9 = arith.constant 0 : index
    %c0_10 = arith.constant 0 : index
    %5 = vector.load %arg8[%c0_9, %c0_10] : memref<1x128xf32, #tpu.memory_space<vmem>>, vector<1x128xf32>
    %c0_11 = arith.constant 0 : index
    %c0_12 = arith.constant 0 : index
    %6 = vector.load %arg0[%c0_11, %c0_12] : memref<64x1xf32, #tpu.memory_space<vmem>>, vector<64x1xf32>
    %7 = vector.broadcast %6 : vector<64x1xf32> to vector<64x128xf32>
    %8 = vector.broadcast %0 : vector<1x128xf32> to vector<64x128xf32>
    %9 = arith.mulf %7, %8 : vector<64x128xf32>
    %10 = vector.broadcast %2 : vector<1x128xf32> to vector<64x128xf32>
    %11 = arith.addf %9, %10 : vector<64x128xf32>
    %c0_13 = arith.constant 0 : index
    %c0_14 = arith.constant 0 : index
    %12 = vector.load %arg10[%c0_13, %c0_14] : memref<64x128xf32, #tpu.memory_space<vmem>>, vector<64x128xf32>
    tpu.vector_store %arg10[%c0_13, %c0_14], %11 {strides = array<i32>} : memref<64x128xf32, #tpu.memory_space<vmem>>, vector<64x128xf32>,
    %c0_15 = arith.constant 0 : index
    %c0_16 = arith.constant 0 : index
    %c0_17 = arith.constant 0 : index
    %13 = vector.load %arg1[%c0_15, %c0_16, %c0_17] : memref<2x8x32xf32, #tpu.memory_space<vmem>>, vector<1x8x32xf32>
    %14 = vector.shape_cast %13 : vector<1x8x32xf32> to vector<8x32xf32>
    %c0_18 = arith.constant 0 : index
    %c0_19 = arith.constant 0 : index
    %c0_20 = arith.constant 0 : index
    %15 = vector.load %arg2[%c0_18, %c0_19, %c0_20] : memref<2x8x32xf32, #tpu.memory_space<vmem>>, vector<1x8x32xf32>
    %16 = vector.shape_cast %15 : vector<1x8x32xf32> to vector<8x32xf32>
    %c1 = arith.constant 1 : index
    %c0_21 = arith.constant 0 : index
    %c0_22 = arith.constant 0 : index
    %17 = vector.load %arg1[%c1, %c0_21, %c0_22] : memref<2x8x32xf32, #tpu.memory_space<vmem>>, vector<1x8x32xf32>
    %18 = vector.shape_cast %17 : vector<1x8x32xf32> to vector<8x32xf32>
    %c1_23 = arith.constant 1 : index
    %c0_24 = arith.constant 0 : index
    %c0_25 = arith.constant 0 : index
    %19 = vector.load %arg2[%c1_23, %c0_24, %c0_25] : memref<2x8x32xf32, #tpu.memory_space<vmem>>, vector<1x8x32xf32>
    %20 = vector.shape_cast %19 : vector<1x8x32xf32> to vector<8x32xf32>
    %c0_i32 = arith.constant 0 : i32
    %c8_i32 = arith.constant 8 : i32
    %21 = arith.muli %c0_i32, %c8_i32 : i32
    %22 = tpu.assume_multiple %21, 8 : i32
    %23 = arith.index_cast %22 : i32 to index
    %c0_26 = arith.constant 0 : index
    %24 = vector.load %arg10[%23, %c0_26] : memref<64x128xf32, #tpu.memory_space<vmem>>, vector<8x128xf32>
    %cst = arith.constant dense<0.000000e+00> : vector<8x128xf32>
    %25 = tpu.matmul %18, %4, %cst {dimension_numbers = #tpu.dot_dimension_numbers<[1], [0], [0], [1], [0, 0, 1, 1], [], []>} : vector<8x32xf32>, vector<32x128xf32>, vector<8x128xf32> -> vector<8x128xf32>
    %26 = vector.broadcast %5 : vector<1x128xf32> to vector<8x128xf32>
    %27 = arith.addf %25, %26 : vector<8x128xf32>
    %cst_27 = arith.constant dense<0.000000e+00> : vector<8x128xf32>
    %28 = tpu.matmul %14, %1, %cst_27 {dimension_numbers = #tpu.dot_dimension_numbers<[1], [0], [0], [1], [0, 0, 1, 1], [], []>} : vector<8x32xf32>, vector<32x128xf32>, vector<8x128xf32> -> vector<8x128xf32>
    %29 = arith.addf %28, %24 : vector<8x128xf32>
    %30 = math.tanh %29 : vector<8x128xf32>
    %31 = vector.extract_strided_slice %30 {offsets = [0, 0], sizes = [8, 32], strides = [1, 1]} : vector<8x128xf32> to vector<8x32xf32>
    %cst_28 = arith.constant 5.000000e-01 : f32
    %32 = vector.broadcast %cst_28 : f32 to vector<8x32xf32>
    %33 = arith.mulf %32, %31 : vector<8x32xf32>
    %cst_29 = arith.constant 5.000000e-01 : f32
    %34 = vector.broadcast %cst_29 : f32 to vector<8x32xf32>
    %35 = arith.addf %33, %34 : vector<8x32xf32>
    %36 = vector.extract_strided_slice %30 {offsets = [0, 32], sizes = [8, 32], strides = [1, 1]} : vector<8x128xf32> to vector<8x32xf32>
    %cst_30 = arith.constant 5.000000e-01 : f32
    %37 = vector.broadcast %cst_30 : f32 to vector<8x32xf32>
    %38 = arith.mulf %37, %36 : vector<8x32xf32>
    %cst_31 = arith.constant 5.000000e-01 : f32
    %39 = vector.broadcast %cst_31 : f32 to vector<8x32xf32>
    %40 = arith.addf %38, %39 : vector<8x32xf32>
    %41 = vector.extract_strided_slice %30 {offsets = [0, 64], sizes = [8, 32], strides = [1, 1]} : vector<8x128xf32> to vector<8x32xf32>
    %42 = vector.extract_strided_slice %30 {offsets = [0, 96], sizes = [8, 32], strides = [1, 1]} : vector<8x128xf32> to vector<8x32xf32>
    %cst_32 = arith.constant 5.000000e-01 : f32
    %43 = vector.broadcast %cst_32 : f32 to vector<8x32xf32>
    %44 = arith.mulf %43, %42 : vector<8x32xf32>
    %cst_33 = arith.constant 5.000000e-01 : f32
    %45 = vector.broadcast %cst_33 : f32 to vector<8x32xf32>
    %46 = arith.addf %44, %45 : vector<8x32xf32>
    %47 = arith.mulf %40, %16 : vector<8x32xf32>
    %48 = arith.mulf %35, %41 : vector<8x32xf32>
    %49 = arith.addf %47, %48 : vector<8x32xf32>
    %50 = math.tanh %49 : vector<8x32xf32>
    %51 = arith.mulf %46, %50 : vector<8x32xf32>
    %cst_34 = arith.constant dense<0.000000e+00> : vector<8x128xf32>
    %52 = tpu.matmul %51, %3, %cst_34 {dimension_numbers = #tpu.dot_dimension_numbers<[1], [0], [0], [1], [0, 0, 1, 1], [], []>} : vector<8x32xf32>, vector<32x128xf32>, vector<8x128xf32> -> vector<8x128xf32>
    %53 = arith.addf %27, %52 : vector<8x128xf32>
    %54 = math.tanh %53 : vector<8x128xf32>
    %55 = vector.extract_strided_slice %54 {offsets = [0, 0], sizes = [8, 32], strides = [1, 1]} : vector<8x128xf32> to vector<8x32xf32>
    %cst_35 = arith.constant 5.000000e-01 : f32
    %56 = vector.broadcast %cst_35 : f32 to vector<8x32xf32>
    %57 = arith.mulf %56, %55 : vector<8x32xf32>
    %cst_36 = arith.constant 5.000000e-01 : f32
    %58 = vector.broadcast %cst_36 : f32 to vector<8x32xf32>
    %59 = arith.addf %57, %58 : vector<8x32xf32>
    %60 = vector.extract_strided_slice %54 {offsets = [0, 32], sizes = [8, 32], strides = [1, 1]} : vector<8x128xf32> to vector<8x32xf32>
    %cst_37 = arith.constant 5.000000e-01 : f32
    %61 = vector.broadcast %cst_37 : f32 to vector<8x32xf32>
    %62 = arith.mulf %61, %60 : vector<8x32xf32>
    %cst_38 = arith.constant 5.000000e-01 : f32
    %63 = vector.broadcast %cst_38 : f32 to vector<8x32xf32>
    %64 = arith.addf %62, %63 : vector<8x32xf32>
    %65 = vector.extract_strided_slice %54 {offsets = [0, 64], sizes = [8, 32], strides = [1, 1]} : vector<8x128xf32> to vector<8x32xf32>
    %66 = vector.extract_strided_slice %54 {offsets = [0, 96], sizes = [8, 32], strides = [1, 1]} : vector<8x128xf32> to vector<8x32xf32>
    %cst_39 = arith.constant 5.000000e-01 : f32
    %67 = vector.broadcast %cst_39 : f32 to vector<8x32xf32>
    %68 = arith.mulf %67, %66 : vector<8x32xf32>
    %cst_40 = arith.constant 5.000000e-01 : f32
    %69 = vector.broadcast %cst_40 : f32 to vector<8x32xf32>
    %70 = arith.addf %68, %69 : vector<8x32xf32>
    %71 = arith.mulf %64, %20 : vector<8x32xf32>
    %72 = arith.mulf %59, %65 : vector<8x32xf32>
    %73 = arith.addf %71, %72 : vector<8x32xf32>
    %74 = math.tanh %73 : vector<8x32xf32>
    %75 = arith.mulf %70, %74 : vector<8x32xf32>
    %76 = arith.index_cast %22 : i32 to index
    %c0_41 = arith.constant 0 : index
    %77 = vector.load %arg9[%76, %c0_41] : memref<64x32xf32, #tpu.memory_space<vmem>>, vector<8x32xf32>
    tpu.vector_store %arg9[%76, %c0_41], %75 {strides = array<i32>} : memref<64x32xf32, #tpu.memory_space<vmem>>, vector<8x32xf32>,
    %c1_i32 = arith.constant 1 : i32
    %c8_i32_42 = arith.constant 8 : i32
    %78 = arith.muli %c1_i32, %c8_i32_42 : i32
    %79 = tpu.assume_multiple %78, 8 : i32
    %80 = arith.index_cast %79 : i32 to index
    %c0_43 = arith.constant 0 : index
    %81 = vector.load %arg10[%80, %c0_43] : memref<64x128xf32, #tpu.memory_space<vmem>>, vector<8x128xf32>
    %cst_44 = arith.constant dense<0.000000e+00> : vector<8x128xf32>
    %82 = tpu.matmul %75, %4, %cst_44 {dimension_numbers = #tpu.dot_dimension_numbers<[1], [0], [0], [1], [0, 0, 1, 1], [], []>} : vector<8x32xf32>, vector<32x128xf32>, vector<8x128xf32> -> vector<8x128xf32>
    %83 = vector.broadcast %5 : vector<1x128xf32> to vector<8x128xf32>
    %84 = arith.addf %82, %83 : vector<8x128xf32>
    %cst_45 = arith.constant dense<0.000000e+00> : vector<8x128xf32>
    %85 = tpu.matmul %51, %1, %cst_45 {dimension_numbers = #tpu.dot_dimension_numbers<[1], [0], [0], [1], [0, 0, 1, 1], [], []>} : vector<8x32xf32>, vector<32x128xf32>, vector<8x128xf32> -> vector<8x128xf32>
    %86 = arith.addf %85, %81 : vector<8x128xf32>
    %87 = math.tanh %86 : vector<8x128xf32>
    %88 = vector.extract_strided_slice %87 {offsets = [0, 0], sizes = [8, 32], strides = [1, 1]} : vector<8x128xf32> to vector<8x32xf32>
    %cst_46 = arith.constant 5.000000e-01 : f32
    %89 = vector.broadcast %cst_46 : f32 to vector<8x32xf32>
    %90 = arith.mulf %89, %88 : vector<8x32xf32>
    %cst_47 = arith.constant 5.000000e-01 : f32
    %91 = vector.broadcast %cst_47 : f32 to vector<8x32xf32>
    %92 = arith.addf %90, %91 : vector<8x32xf32>
    %93 = vector.extract_strided_slice %87 {offsets = [0, 32], sizes = [8, 32], strides = [1, 1]} : vector<8x128xf32> to vector<8x32xf32>
    %cst_48 = arith.constant 5.000000e-01 : f32
    %94 = vector.broadcast %cst_48 : f32 to vector<8x32xf32>
    %95 = arith.mulf %94, %93 : vector<8x32xf32>
    %cst_49 = arith.constant 5.000000e-01 : f32
    %96 = vector.broadcast %cst_49 : f32 to vector<8x32xf32>
    %97 = arith.addf %95, %96 : vector<8x32xf32>
    %98 = vector.extract_strided_slice %87 {offsets = [0, 64], sizes = [8, 32], strides = [1, 1]} : vector<8x128xf32> to vector<8x32xf32>
    %99 = vector.extract_strided_slice %87 {offsets = [0, 96], sizes = [8, 32], strides = [1, 1]} : vector<8x128xf32> to vector<8x32xf32>
    %cst_50 = arith.constant 5.000000e-01 : f32
    %100 = vector.broadcast %cst_50 : f32 to vector<8x32xf32>
    %101 = arith.mulf %100, %99 : vector<8x32xf32>
    %cst_51 = arith.constant 5.000000e-01 : f32
    %102 = vector.broadcast %cst_51 : f32 to vector<8x32xf32>
    %103 = arith.addf %101, %102 : vector<8x32xf32>
    %104 = arith.mulf %97, %49 : vector<8x32xf32>
    %105 = arith.mulf %92, %98 : vector<8x32xf32>
    %106 = arith.addf %104, %105 : vector<8x32xf32>
    %107 = math.tanh %106 : vector<8x32xf32>
    %108 = arith.mulf %103, %107 : vector<8x32xf32>
    %cst_52 = arith.constant dense<0.000000e+00> : vector<8x128xf32>
    %109 = tpu.matmul %108, %3, %cst_52 {dimension_numbers = #tpu.dot_dimension_numbers<[1], [0], [0], [1], [0, 0, 1, 1], [], []>} : vector<8x32xf32>, vector<32x128xf32>, vector<8x128xf32> -> vector<8x128xf32>
    %110 = arith.addf %84, %109 : vector<8x128xf32>
    %111 = math.tanh %110 : vector<8x128xf32>
    %112 = vector.extract_strided_slice %111 {offsets = [0, 0], sizes = [8, 32], strides = [1, 1]} : vector<8x128xf32> to vector<8x32xf32>
    %cst_53 = arith.constant 5.000000e-01 : f32
    %113 = vector.broadcast %cst_53 : f32 to vector<8x32xf32>
    %114 = arith.mulf %113, %112 : vector<8x32xf32>
    %cst_54 = arith.constant 5.000000e-01 : f32
    %115 = vector.broadcast %cst_54 : f32 to vector<8x32xf32>
    %116 = arith.addf %114, %115 : vector<8x32xf32>
    %117 = vector.extract_strided_slice %111 {offsets = [0, 32], sizes = [8, 32], strides = [1, 1]} : vector<8x128xf32> to vector<8x32xf32>
    %cst_55 = arith.constant 5.000000e-01 : f32
    %118 = vector.broadcast %cst_55 : f32 to vector<8x32xf32>
    %119 = arith.mulf %118, %117 : vector<8x32xf32>
    %cst_56 = arith.constant 5.000000e-01 : f32
    %120 = vector.broadcast %cst_56 : f32 to vector<8x32xf32>
    %121 = arith.addf %119, %120 : vector<8x32xf32>
    %122 = vector.extract_strided_slice %111 {offsets = [0, 64], sizes = [8, 32], strides = [1, 1]} : vector<8x128xf32> to vector<8x32xf32>
    %123 = vector.extract_strided_slice %111 {offsets = [0, 96], sizes = [8, 32], strides = [1, 1]} : vector<8x128xf32> to vector<8x32xf32>
    %cst_57 = arith.constant 5.000000e-01 : f32
    %124 = vector.broadcast %cst_57 : f32 to vector<8x32xf32>
    %125 = arith.mulf %124, %123 : vector<8x32xf32>
    %cst_58 = arith.constant 5.000000e-01 : f32
    %126 = vector.broadcast %cst_58 : f32 to vector<8x32xf32>
    %127 = arith.addf %125, %126 : vector<8x32xf32>
    %128 = arith.mulf %121, %73 : vector<8x32xf32>
    %129 = arith.mulf %116, %122 : vector<8x32xf32>
    %130 = arith.addf %128, %129 : vector<8x32xf32>
    %131 = math.tanh %130 : vector<8x32xf32>
    %132 = arith.mulf %127, %131 : vector<8x32xf32>
    %133 = arith.index_cast %79 : i32 to index
    %c0_59 = arith.constant 0 : index
    %134 = vector.load %arg9[%133, %c0_59] : memref<64x32xf32, #tpu.memory_space<vmem>>, vector<8x32xf32>
    tpu.vector_store %arg9[%133, %c0_59], %132 {strides = array<i32>} : memref<64x32xf32, #tpu.memory_space<vmem>>, vector<8x32xf32>,
    %c2_i32 = arith.constant 2 : i32
    %c8_i32_60 = arith.constant 8 : i32
    %135 = arith.muli %c2_i32, %c8_i32_60 : i32
    %136 = tpu.assume_multiple %135, 8 : i32
    %137 = arith.index_cast %136 : i32 to index
    %c0_61 = arith.constant 0 : index
    %138 = vector.load %arg10[%137, %c0_61] : memref<64x128xf32, #tpu.memory_space<vmem>>, vector<8x128xf32>
    %cst_62 = arith.constant dense<0.000000e+00> : vector<8x128xf32>
    %139 = tpu.matmul %132, %4, %cst_62 {dimension_numbers = #tpu.dot_dimension_numbers<[1], [0], [0], [1], [0, 0, 1, 1], [], []>} : vector<8x32xf32>, vector<32x128xf32>, vector<8x128xf32> -> vector<8x128xf32>
    %140 = vector.broadcast %5 : vector<1x128xf32> to vector<8x128xf32>
    %141 = arith.addf %139, %140 : vector<8x128xf32>
    %cst_63 = arith.constant dense<0.000000e+00> : vector<8x128xf32>
    %142 = tpu.matmul %108, %1, %cst_63 {dimension_numbers = #tpu.dot_dimension_numbers<[1], [0], [0], [1], [0, 0, 1, 1], [], []>} : vector<8x32xf32>, vector<32x128xf32>, vector<8x128xf32> -> vector<8x128xf32>
    %143 = arith.addf %142, %138 : vector<8x128xf32>
    %144 = math.tanh %143 : vector<8x128xf32>
    %145 = vector.extract_strided_slice %144 {offsets = [0, 0], sizes = [8, 32], strides = [1, 1]} : vector<8x128xf32> to vector<8x32xf32>
    %cst_64 = arith.constant 5.000000e-01 : f32
    %146 = vector.broadcast %cst_64 : f32 to vector<8x32xf32>
    %147 = arith.mulf %146, %145 : vector<8x32xf32>
    %cst_65 = arith.constant 5.000000e-01 : f32
    %148 = vector.broadcast %cst_65 : f32 to vector<8x32xf32>
    %149 = arith.addf %147, %148 : vector<8x32xf32>
    %150 = vector.extract_strided_slice %144 {offsets = [0, 32], sizes = [8, 32], strides = [1, 1]} : vector<8x128xf32> to vector<8x32xf32>
    %cst_66 = arith.constant 5.000000e-01 : f32
    %151 = vector.broadcast %cst_66 : f32 to vector<8x32xf32>
    %152 = arith.mulf %151, %150 : vector<8x32xf32>
    %cst_67 = arith.constant 5.000000e-01 : f32
    %153 = vector.broadcast %cst_67 : f32 to vector<8x32xf32>
    %154 = arith.addf %152, %153 : vector<8x32xf32>
    %155 = vector.extract_strided_slice %144 {offsets = [0, 64], sizes = [8, 32], strides = [1, 1]} : vector<8x128xf32> to vector<8x32xf32>
    %156 = vector.extract_strided_slice %144 {offsets = [0, 96], sizes = [8, 32], strides = [1, 1]} : vector<8x128xf32> to vector<8x32xf32>
    %cst_68 = arith.constant 5.000000e-01 : f32
    %157 = vector.broadcast %cst_68 : f32 to vector<8x32xf32>
    %158 = arith.mulf %157, %156 : vector<8x32xf32>
    %cst_69 = arith.constant 5.000000e-01 : f32
    %159 = vector.broadcast %cst_69 : f32 to vector<8x32xf32>
    %160 = arith.addf %158, %159 : vector<8x32xf32>
    %161 = arith.mulf %154, %106 : vector<8x32xf32>
    %162 = arith.mulf %149, %155 : vector<8x32xf32>
    %163 = arith.addf %161, %162 : vector<8x32xf32>
    %164 = math.tanh %163 : vector<8x32xf32>
    %165 = arith.mulf %160, %164 : vector<8x32xf32>
    %cst_70 = arith.constant dense<0.000000e+00> : vector<8x128xf32>
    %166 = tpu.matmul %165, %3, %cst_70 {dimension_numbers = #tpu.dot_dimension_numbers<[1], [0], [0], [1], [0, 0, 1, 1], [], []>} : vector<8x32xf32>, vector<32x128xf32>, vector<8x128xf32> -> vector<8x128xf32>
    %167 = arith.addf %141, %166 : vector<8x128xf32>
    %168 = math.tanh %167 : vector<8x128xf32>
    %169 = vector.extract_strided_slice %168 {offsets = [0, 0], sizes = [8, 32], strides = [1, 1]} : vector<8x128xf32> to vector<8x32xf32>
    %cst_71 = arith.constant 5.000000e-01 : f32
    %170 = vector.broadcast %cst_71 : f32 to vector<8x32xf32>
    %171 = arith.mulf %170, %169 : vector<8x32xf32>
    %cst_72 = arith.constant 5.000000e-01 : f32
    %172 = vector.broadcast %cst_72 : f32 to vector<8x32xf32>
    %173 = arith.addf %171, %172 : vector<8x32xf32>
    %174 = vector.extract_strided_slice %168 {offsets = [0, 32], sizes = [8, 32], strides = [1, 1]} : vector<8x128xf32> to vector<8x32xf32>
    %cst_73 = arith.constant 5.000000e-01 : f32
    %175 = vector.broadcast %cst_73 : f32 to vector<8x32xf32>
    %176 = arith.mulf %175, %174 : vector<8x32xf32>
    %cst_74 = arith.constant 5.000000e-01 : f32
    %177 = vector.broadcast %cst_74 : f32 to vector<8x32xf32>
    %178 = arith.addf %176, %177 : vector<8x32xf32>
    %179 = vector.extract_strided_slice %168 {offsets = [0, 64], sizes = [8, 32], strides = [1, 1]} : vector<8x128xf32> to vector<8x32xf32>
    %180 = vector.extract_strided_slice %168 {offsets = [0, 96], sizes = [8, 32], strides = [1, 1]} : vector<8x128xf32> to vector<8x32xf32>
    %cst_75 = arith.constant 5.000000e-01 : f32
    %181 = vector.broadcast %cst_75 : f32 to vector<8x32xf32>
    %182 = arith.mulf %181, %180 : vector<8x32xf32>
    %cst_76 = arith.constant 5.000000e-01 : f32
    %183 = vector.broadcast %cst_76 : f32 to vector<8x32xf32>
    %184 = arith.addf %182, %183 : vector<8x32xf32>
    %185 = arith.mulf %178, %130 : vector<8x32xf32>
    %186 = arith.mulf %173, %179 : vector<8x32xf32>
    %187 = arith.addf %185, %186 : vector<8x32xf32>
    %188 = math.tanh %187 : vector<8x32xf32>
    %189 = arith.mulf %184, %188 : vector<8x32xf32>
    %190 = arith.index_cast %136 : i32 to index
    %c0_77 = arith.constant 0 : index
    %191 = vector.load %arg9[%190, %c0_77] : memref<64x32xf32, #tpu.memory_space<vmem>>, vector<8x32xf32>
    tpu.vector_store %arg9[%190, %c0_77], %189 {strides = array<i32>} : memref<64x32xf32, #tpu.memory_space<vmem>>, vector<8x32xf32>,
    %c3_i32 = arith.constant 3 : i32
    %c8_i32_78 = arith.constant 8 : i32
    %192 = arith.muli %c3_i32, %c8_i32_78 : i32
    %193 = tpu.assume_multiple %192, 8 : i32
    %194 = arith.index_cast %193 : i32 to index
    %c0_79 = arith.constant 0 : index
    %195 = vector.load %arg10[%194, %c0_79] : memref<64x128xf32, #tpu.memory_space<vmem>>, vector<8x128xf32>
    %cst_80 = arith.constant dense<0.000000e+00> : vector<8x128xf32>
    %196 = tpu.matmul %189, %4, %cst_80 {dimension_numbers = #tpu.dot_dimension_numbers<[1], [0], [0], [1], [0, 0, 1, 1], [], []>} : vector<8x32xf32>, vector<32x128xf32>, vector<8x128xf32> -> vector<8x128xf32>
    %197 = vector.broadcast %5 : vector<1x128xf32> to vector<8x128xf32>
    %198 = arith.addf %196, %197 : vector<8x128xf32>
    %cst_81 = arith.constant dense<0.000000e+00> : vector<8x128xf32>
    %199 = tpu.matmul %165, %1, %cst_81 {dimension_numbers = #tpu.dot_dimension_numbers<[1], [0], [0], [1], [0, 0, 1, 1], [], []>} : vector<8x32xf32>, vector<32x128xf32>, vector<8x128xf32> -> vector<8x128xf32>
    %200 = arith.addf %199, %195 : vector<8x128xf32>
    %201 = math.tanh %200 : vector<8x128xf32>
    %202 = vector.extract_strided_slice %201 {offsets = [0, 0], sizes = [8, 32], strides = [1, 1]} : vector<8x128xf32> to vector<8x32xf32>
    %cst_82 = arith.constant 5.000000e-01 : f32
    %203 = vector.broadcast %cst_82 : f32 to vector<8x32xf32>
    %204 = arith.mulf %203, %202 : vector<8x32xf32>
    %cst_83 = arith.constant 5.000000e-01 : f32
    %205 = vector.broadcast %cst_83 : f32 to vector<8x32xf32>
    %206 = arith.addf %204, %205 : vector<8x32xf32>
    %207 = vector.extract_strided_slice %201 {offsets = [0, 32], sizes = [8, 32], strides = [1, 1]} : vector<8x128xf32> to vector<8x32xf32>
    %cst_84 = arith.constant 5.000000e-01 : f32
    %208 = vector.broadcast %cst_84 : f32 to vector<8x32xf32>
    %209 = arith.mulf %208, %207 : vector<8x32xf32>
    %cst_85 = arith.constant 5.000000e-01 : f32
    %210 = vector.broadcast %cst_85 : f32 to vector<8x32xf32>
    %211 = arith.addf %209, %210 : vector<8x32xf32>
    %212 = vector.extract_strided_slice %201 {offsets = [0, 64], sizes = [8, 32], strides = [1, 1]} : vector<8x128xf32> to vector<8x32xf32>
    %213 = vector.extract_strided_slice %201 {offsets = [0, 96], sizes = [8, 32], strides = [1, 1]} : vector<8x128xf32> to vector<8x32xf32>
    %cst_86 = arith.constant 5.000000e-01 : f32
    %214 = vector.broadcast %cst_86 : f32 to vector<8x32xf32>
    %215 = arith.mulf %214, %213 : vector<8x32xf32>
    %cst_87 = arith.constant 5.000000e-01 : f32
    %216 = vector.broadcast %cst_87 : f32 to vector<8x32xf32>
    %217 = arith.addf %215, %216 : vector<8x32xf32>
    %218 = arith.mulf %211, %163 : vector<8x32xf32>
    %219 = arith.mulf %206, %212 : vector<8x32xf32>
    %220 = arith.addf %218, %219 : vector<8x32xf32>
    %221 = math.tanh %220 : vector<8x32xf32>
    %222 = arith.mulf %217, %221 : vector<8x32xf32>
    %cst_88 = arith.constant dense<0.000000e+00> : vector<8x128xf32>
    %223 = tpu.matmul %222, %3, %cst_88 {dimension_numbers = #tpu.dot_dimension_numbers<[1], [0], [0], [1], [0, 0, 1, 1], [], []>} : vector<8x32xf32>, vector<32x128xf32>, vector<8x128xf32> -> vector<8x128xf32>
    %224 = arith.addf %198, %223 : vector<8x128xf32>
    %225 = math.tanh %224 : vector<8x128xf32>
    %226 = vector.extract_strided_slice %225 {offsets = [0, 0], sizes = [8, 32], strides = [1, 1]} : vector<8x128xf32> to vector<8x32xf32>
    %cst_89 = arith.constant 5.000000e-01 : f32
    %227 = vector.broadcast %cst_89 : f32 to vector<8x32xf32>
    %228 = arith.mulf %227, %226 : vector<8x32xf32>
    %cst_90 = arith.constant 5.000000e-01 : f32
    %229 = vector.broadcast %cst_90 : f32 to vector<8x32xf32>
    %230 = arith.addf %228, %229 : vector<8x32xf32>
    %231 = vector.extract_strided_slice %225 {offsets = [0, 32], sizes = [8, 32], strides = [1, 1]} : vector<8x128xf32> to vector<8x32xf32>
    %cst_91 = arith.constant 5.000000e-01 : f32
    %232 = vector.broadcast %cst_91 : f32 to vector<8x32xf32>
    %233 = arith.mulf %232, %231 : vector<8x32xf32>
    %cst_92 = arith.constant 5.000000e-01 : f32
    %234 = vector.broadcast %cst_92 : f32 to vector<8x32xf32>
    %235 = arith.addf %233, %234 : vector<8x32xf32>
    %236 = vector.extract_strided_slice %225 {offsets = [0, 64], sizes = [8, 32], strides = [1, 1]} : vector<8x128xf32> to vector<8x32xf32>
    %237 = vector.extract_strided_slice %225 {offsets = [0, 96], sizes = [8, 32], strides = [1, 1]} : vector<8x128xf32> to vector<8x32xf32>
    %cst_93 = arith.constant 5.000000e-01 : f32
    %238 = vector.broadcast %cst_93 : f32 to vector<8x32xf32>
    %239 = arith.mulf %238, %237 : vector<8x32xf32>
    %cst_94 = arith.constant 5.000000e-01 : f32
    %240 = vector.broadcast %cst_94 : f32 to vector<8x32xf32>
    %241 = arith.addf %239, %240 : vector<8x32xf32>
    %242 = arith.mulf %235, %187 : vector<8x32xf32>
    %243 = arith.mulf %230, %236 : vector<8x32xf32>
    %244 = arith.addf %242, %243 : vector<8x32xf32>
    %245 = math.tanh %244 : vector<8x32xf32>
    %246 = arith.mulf %241, %245 : vector<8x32xf32>
    %247 = arith.index_cast %193 : i32 to index
    %c0_95 = arith.constant 0 : index
    %248 = vector.load %arg9[%247, %c0_95] : memref<64x32xf32, #tpu.memory_space<vmem>>, vector<8x32xf32>
    tpu.vector_store %arg9[%247, %c0_95], %246 {strides = array<i32>} : memref<64x32xf32, #tpu.memory_space<vmem>>, vector<8x32xf32>,
    %c4_i32 = arith.constant 4 : i32
    %c8_i32_96 = arith.constant 8 : i32
    %249 = arith.muli %c4_i32, %c8_i32_96 : i32
    %250 = tpu.assume_multiple %249, 8 : i32
    %251 = arith.index_cast %250 : i32 to index
    %c0_97 = arith.constant 0 : index
    %252 = vector.load %arg10[%251, %c0_97] : memref<64x128xf32, #tpu.memory_space<vmem>>, vector<8x128xf32>
    %cst_98 = arith.constant dense<0.000000e+00> : vector<8x128xf32>
    %253 = tpu.matmul %246, %4, %cst_98 {dimension_numbers = #tpu.dot_dimension_numbers<[1], [0], [0], [1], [0, 0, 1, 1], [], []>} : vector<8x32xf32>, vector<32x128xf32>, vector<8x128xf32> -> vector<8x128xf32>
    %254 = vector.broadcast %5 : vector<1x128xf32> to vector<8x128xf32>
    %255 = arith.addf %253, %254 : vector<8x128xf32>
    %cst_99 = arith.constant dense<0.000000e+00> : vector<8x128xf32>
    %256 = tpu.matmul %222, %1, %cst_99 {dimension_numbers = #tpu.dot_dimension_numbers<[1], [0], [0], [1], [0, 0, 1, 1], [], []>} : vector<8x32xf32>, vector<32x128xf32>, vector<8x128xf32> -> vector<8x128xf32>
    %257 = arith.addf %256, %252 : vector<8x128xf32>
    %258 = math.tanh %257 : vector<8x128xf32>
    %259 = vector.extract_strided_slice %258 {offsets = [0, 0], sizes = [8, 32], strides = [1, 1]} : vector<8x128xf32> to vector<8x32xf32>
    %cst_100 = arith.constant 5.000000e-01 : f32
    %260 = vector.broadcast %cst_100 : f32 to vector<8x32xf32>
    %261 = arith.mulf %260, %259 : vector<8x32xf32>
    %cst_101 = arith.constant 5.000000e-01 : f32
    %262 = vector.broadcast %cst_101 : f32 to vector<8x32xf32>
    %263 = arith.addf %261, %262 : vector<8x32xf32>
    %264 = vector.extract_strided_slice %258 {offsets = [0, 32], sizes = [8, 32], strides = [1, 1]} : vector<8x128xf32> to vector<8x32xf32>
    %cst_102 = arith.constant 5.000000e-01 : f32
    %265 = vector.broadcast %cst_102 : f32 to vector<8x32xf32>
    %266 = arith.mulf %265, %264 : vector<8x32xf32>
    %cst_103 = arith.constant 5.000000e-01 : f32
    %267 = vector.broadcast %cst_103 : f32 to vector<8x32xf32>
    %268 = arith.addf %266, %267 : vector<8x32xf32>
    %269 = vector.extract_strided_slice %258 {offsets = [0, 64], sizes = [8, 32], strides = [1, 1]} : vector<8x128xf32> to vector<8x32xf32>
    %270 = vector.extract_strided_slice %258 {offsets = [0, 96], sizes = [8, 32], strides = [1, 1]} : vector<8x128xf32> to vector<8x32xf32>
    %cst_104 = arith.constant 5.000000e-01 : f32
    %271 = vector.broadcast %cst_104 : f32 to vector<8x32xf32>
    %272 = arith.mulf %271, %270 : vector<8x32xf32>
    %cst_105 = arith.constant 5.000000e-01 : f32
    %273 = vector.broadcast %cst_105 : f32 to vector<8x32xf32>
    %274 = arith.addf %272, %273 : vector<8x32xf32>
    %275 = arith.mulf %268, %220 : vector<8x32xf32>
    %276 = arith.mulf %263, %269 : vector<8x32xf32>
    %277 = arith.addf %275, %276 : vector<8x32xf32>
    %278 = math.tanh %277 : vector<8x32xf32>
    %279 = arith.mulf %274, %278 : vector<8x32xf32>
    %cst_106 = arith.constant dense<0.000000e+00> : vector<8x128xf32>
    %280 = tpu.matmul %279, %3, %cst_106 {dimension_numbers = #tpu.dot_dimension_numbers<[1], [0], [0], [1], [0, 0, 1, 1], [], []>} : vector<8x32xf32>, vector<32x128xf32>, vector<8x128xf32> -> vector<8x128xf32>
    %281 = arith.addf %255, %280 : vector<8x128xf32>
    %282 = math.tanh %281 : vector<8x128xf32>
    %283 = vector.extract_strided_slice %282 {offsets = [0, 0], sizes = [8, 32], strides = [1, 1]} : vector<8x128xf32> to vector<8x32xf32>
    %cst_107 = arith.constant 5.000000e-01 : f32
    %284 = vector.broadcast %cst_107 : f32 to vector<8x32xf32>
    %285 = arith.mulf %284, %283 : vector<8x32xf32>
    %cst_108 = arith.constant 5.000000e-01 : f32
    %286 = vector.broadcast %cst_108 : f32 to vector<8x32xf32>
    %287 = arith.addf %285, %286 : vector<8x32xf32>
    %288 = vector.extract_strided_slice %282 {offsets = [0, 32], sizes = [8, 32], strides = [1, 1]} : vector<8x128xf32> to vector<8x32xf32>
    %cst_109 = arith.constant 5.000000e-01 : f32
    %289 = vector.broadcast %cst_109 : f32 to vector<8x32xf32>
    %290 = arith.mulf %289, %288 : vector<8x32xf32>
    %cst_110 = arith.constant 5.000000e-01 : f32
    %291 = vector.broadcast %cst_110 : f32 to vector<8x32xf32>
    %292 = arith.addf %290, %291 : vector<8x32xf32>
    %293 = vector.extract_strided_slice %282 {offsets = [0, 64], sizes = [8, 32], strides = [1, 1]} : vector<8x128xf32> to vector<8x32xf32>
    %294 = vector.extract_strided_slice %282 {offsets = [0, 96], sizes = [8, 32], strides = [1, 1]} : vector<8x128xf32> to vector<8x32xf32>
    %cst_111 = arith.constant 5.000000e-01 : f32
    %295 = vector.broadcast %cst_111 : f32 to vector<8x32xf32>
    %296 = arith.mulf %295, %294 : vector<8x32xf32>
    %cst_112 = arith.constant 5.000000e-01 : f32
    %297 = vector.broadcast %cst_112 : f32 to vector<8x32xf32>
    %298 = arith.addf %296, %297 : vector<8x32xf32>
    %299 = arith.mulf %292, %244 : vector<8x32xf32>
    %300 = arith.mulf %287, %293 : vector<8x32xf32>
    %301 = arith.addf %299, %300 : vector<8x32xf32>
    %302 = math.tanh %301 : vector<8x32xf32>
    %303 = arith.mulf %298, %302 : vector<8x32xf32>
    %304 = arith.index_cast %250 : i32 to index
    %c0_113 = arith.constant 0 : index
    %305 = vector.load %arg9[%304, %c0_113] : memref<64x32xf32, #tpu.memory_space<vmem>>, vector<8x32xf32>
    tpu.vector_store %arg9[%304, %c0_113], %303 {strides = array<i32>} : memref<64x32xf32, #tpu.memory_space<vmem>>, vector<8x32xf32>,
    %c5_i32 = arith.constant 5 : i32
    %c8_i32_114 = arith.constant 8 : i32
    %306 = arith.muli %c5_i32, %c8_i32_114 : i32
    %307 = tpu.assume_multiple %306, 8 : i32
    %308 = arith.index_cast %307 : i32 to index
    %c0_115 = arith.constant 0 : index
    %309 = vector.load %arg10[%308, %c0_115] : memref<64x128xf32, #tpu.memory_space<vmem>>, vector<8x128xf32>
    %cst_116 = arith.constant dense<0.000000e+00> : vector<8x128xf32>
    %310 = tpu.matmul %303, %4, %cst_116 {dimension_numbers = #tpu.dot_dimension_numbers<[1], [0], [0], [1], [0, 0, 1, 1], [], []>} : vector<8x32xf32>, vector<32x128xf32>, vector<8x128xf32> -> vector<8x128xf32>
    %311 = vector.broadcast %5 : vector<1x128xf32> to vector<8x128xf32>
    %312 = arith.addf %310, %311 : vector<8x128xf32>
    %cst_117 = arith.constant dense<0.000000e+00> : vector<8x128xf32>
    %313 = tpu.matmul %279, %1, %cst_117 {dimension_numbers = #tpu.dot_dimension_numbers<[1], [0], [0], [1], [0, 0, 1, 1], [], []>} : vector<8x32xf32>, vector<32x128xf32>, vector<8x128xf32> -> vector<8x128xf32>
    %314 = arith.addf %313, %309 : vector<8x128xf32>
    %315 = math.tanh %314 : vector<8x128xf32>
    %316 = vector.extract_strided_slice %315 {offsets = [0, 0], sizes = [8, 32], strides = [1, 1]} : vector<8x128xf32> to vector<8x32xf32>
    %cst_118 = arith.constant 5.000000e-01 : f32
    %317 = vector.broadcast %cst_118 : f32 to vector<8x32xf32>
    %318 = arith.mulf %317, %316 : vector<8x32xf32>
    %cst_119 = arith.constant 5.000000e-01 : f32
    %319 = vector.broadcast %cst_119 : f32 to vector<8x32xf32>
    %320 = arith.addf %318, %319 : vector<8x32xf32>
    %321 = vector.extract_strided_slice %315 {offsets = [0, 32], sizes = [8, 32], strides = [1, 1]} : vector<8x128xf32> to vector<8x32xf32>
    %cst_120 = arith.constant 5.000000e-01 : f32
    %322 = vector.broadcast %cst_120 : f32 to vector<8x32xf32>
    %323 = arith.mulf %322, %321 : vector<8x32xf32>
    %cst_121 = arith.constant 5.000000e-01 : f32
    %324 = vector.broadcast %cst_121 : f32 to vector<8x32xf32>
    %325 = arith.addf %323, %324 : vector<8x32xf32>
    %326 = vector.extract_strided_slice %315 {offsets = [0, 64], sizes = [8, 32], strides = [1, 1]} : vector<8x128xf32> to vector<8x32xf32>
    %327 = vector.extract_strided_slice %315 {offsets = [0, 96], sizes = [8, 32], strides = [1, 1]} : vector<8x128xf32> to vector<8x32xf32>
    %cst_122 = arith.constant 5.000000e-01 : f32
    %328 = vector.broadcast %cst_122 : f32 to vector<8x32xf32>
    %329 = arith.mulf %328, %327 : vector<8x32xf32>
    %cst_123 = arith.constant 5.000000e-01 : f32
    %330 = vector.broadcast %cst_123 : f32 to vector<8x32xf32>
    %331 = arith.addf %329, %330 : vector<8x32xf32>
    %332 = arith.mulf %325, %277 : vector<8x32xf32>
    %333 = arith.mulf %320, %326 : vector<8x32xf32>
    %334 = arith.addf %332, %333 : vector<8x32xf32>
    %335 = math.tanh %334 : vector<8x32xf32>
    %336 = arith.mulf %331, %335 : vector<8x32xf32>
    %cst_124 = arith.constant dense<0.000000e+00> : vector<8x128xf32>
    %337 = tpu.matmul %336, %3, %cst_124 {dimension_numbers = #tpu.dot_dimension_numbers<[1], [0], [0], [1], [0, 0, 1, 1], [], []>} : vector<8x32xf32>, vector<32x128xf32>, vector<8x128xf32> -> vector<8x128xf32>
    %338 = arith.addf %312, %337 : vector<8x128xf32>
    %339 = math.tanh %338 : vector<8x128xf32>
    %340 = vector.extract_strided_slice %339 {offsets = [0, 0], sizes = [8, 32], strides = [1, 1]} : vector<8x128xf32> to vector<8x32xf32>
    %cst_125 = arith.constant 5.000000e-01 : f32
    %341 = vector.broadcast %cst_125 : f32 to vector<8x32xf32>
    %342 = arith.mulf %341, %340 : vector<8x32xf32>
    %cst_126 = arith.constant 5.000000e-01 : f32
    %343 = vector.broadcast %cst_126 : f32 to vector<8x32xf32>
    %344 = arith.addf %342, %343 : vector<8x32xf32>
    %345 = vector.extract_strided_slice %339 {offsets = [0, 32], sizes = [8, 32], strides = [1, 1]} : vector<8x128xf32> to vector<8x32xf32>
    %cst_127 = arith.constant 5.000000e-01 : f32
    %346 = vector.broadcast %cst_127 : f32 to vector<8x32xf32>
    %347 = arith.mulf %346, %345 : vector<8x32xf32>
    %cst_128 = arith.constant 5.000000e-01 : f32
    %348 = vector.broadcast %cst_128 : f32 to vector<8x32xf32>
    %349 = arith.addf %347, %348 : vector<8x32xf32>
    %350 = vector.extract_strided_slice %339 {offsets = [0, 64], sizes = [8, 32], strides = [1, 1]} : vector<8x128xf32> to vector<8x32xf32>
    %351 = vector.extract_strided_slice %339 {offsets = [0, 96], sizes = [8, 32], strides = [1, 1]} : vector<8x128xf32> to vector<8x32xf32>
    %cst_129 = arith.constant 5.000000e-01 : f32
    %352 = vector.broadcast %cst_129 : f32 to vector<8x32xf32>
    %353 = arith.mulf %352, %351 : vector<8x32xf32>
    %cst_130 = arith.constant 5.000000e-01 : f32
    %354 = vector.broadcast %cst_130 : f32 to vector<8x32xf32>
    %355 = arith.addf %353, %354 : vector<8x32xf32>
    %356 = arith.mulf %349, %301 : vector<8x32xf32>
    %357 = arith.mulf %344, %350 : vector<8x32xf32>
    %358 = arith.addf %356, %357 : vector<8x32xf32>
    %359 = math.tanh %358 : vector<8x32xf32>
    %360 = arith.mulf %355, %359 : vector<8x32xf32>
    %361 = arith.index_cast %307 : i32 to index
    %c0_131 = arith.constant 0 : index
    %362 = vector.load %arg9[%361, %c0_131] : memref<64x32xf32, #tpu.memory_space<vmem>>, vector<8x32xf32>
    tpu.vector_store %arg9[%361, %c0_131], %360 {strides = array<i32>} : memref<64x32xf32, #tpu.memory_space<vmem>>, vector<8x32xf32>,
    %c6_i32 = arith.constant 6 : i32
    %c8_i32_132 = arith.constant 8 : i32
    %363 = arith.muli %c6_i32, %c8_i32_132 : i32
    %364 = tpu.assume_multiple %363, 8 : i32
    %365 = arith.index_cast %364 : i32 to index
    %c0_133 = arith.constant 0 : index
    %366 = vector.load %arg10[%365, %c0_133] : memref<64x128xf32, #tpu.memory_space<vmem>>, vector<8x128xf32>
    %cst_134 = arith.constant dense<0.000000e+00> : vector<8x128xf32>
    %367 = tpu.matmul %360, %4, %cst_134 {dimension_numbers = #tpu.dot_dimension_numbers<[1], [0], [0], [1], [0, 0, 1, 1], [], []>} : vector<8x32xf32>, vector<32x128xf32>, vector<8x128xf32> -> vector<8x128xf32>
    %368 = vector.broadcast %5 : vector<1x128xf32> to vector<8x128xf32>
    %369 = arith.addf %367, %368 : vector<8x128xf32>
    %cst_135 = arith.constant dense<0.000000e+00> : vector<8x128xf32>
    %370 = tpu.matmul %336, %1, %cst_135 {dimension_numbers = #tpu.dot_dimension_numbers<[1], [0], [0], [1], [0, 0, 1, 1], [], []>} : vector<8x32xf32>, vector<32x128xf32>, vector<8x128xf32> -> vector<8x128xf32>
    %371 = arith.addf %370, %366 : vector<8x128xf32>
    %372 = math.tanh %371 : vector<8x128xf32>
    %373 = vector.extract_strided_slice %372 {offsets = [0, 0], sizes = [8, 32], strides = [1, 1]} : vector<8x128xf32> to vector<8x32xf32>
    %cst_136 = arith.constant 5.000000e-01 : f32
    %374 = vector.broadcast %cst_136 : f32 to vector<8x32xf32>
    %375 = arith.mulf %374, %373 : vector<8x32xf32>
    %cst_137 = arith.constant 5.000000e-01 : f32
    %376 = vector.broadcast %cst_137 : f32 to vector<8x32xf32>
    %377 = arith.addf %375, %376 : vector<8x32xf32>
    %378 = vector.extract_strided_slice %372 {offsets = [0, 32], sizes = [8, 32], strides = [1, 1]} : vector<8x128xf32> to vector<8x32xf32>
    %cst_138 = arith.constant 5.000000e-01 : f32
    %379 = vector.broadcast %cst_138 : f32 to vector<8x32xf32>
    %380 = arith.mulf %379, %378 : vector<8x32xf32>
    %cst_139 = arith.constant 5.000000e-01 : f32
    %381 = vector.broadcast %cst_139 : f32 to vector<8x32xf32>
    %382 = arith.addf %380, %381 : vector<8x32xf32>
    %383 = vector.extract_strided_slice %372 {offsets = [0, 64], sizes = [8, 32], strides = [1, 1]} : vector<8x128xf32> to vector<8x32xf32>
    %384 = vector.extract_strided_slice %372 {offsets = [0, 96], sizes = [8, 32], strides = [1, 1]} : vector<8x128xf32> to vector<8x32xf32>
    %cst_140 = arith.constant 5.000000e-01 : f32
    %385 = vector.broadcast %cst_140 : f32 to vector<8x32xf32>
    %386 = arith.mulf %385, %384 : vector<8x32xf32>
    %cst_141 = arith.constant 5.000000e-01 : f32
    %387 = vector.broadcast %cst_141 : f32 to vector<8x32xf32>
    %388 = arith.addf %386, %387 : vector<8x32xf32>
    %389 = arith.mulf %382, %334 : vector<8x32xf32>
    %390 = arith.mulf %377, %383 : vector<8x32xf32>
    %391 = arith.addf %389, %390 : vector<8x32xf32>
    %392 = math.tanh %391 : vector<8x32xf32>
    %393 = arith.mulf %388, %392 : vector<8x32xf32>
    %cst_142 = arith.constant dense<0.000000e+00> : vector<8x128xf32>
    %394 = tpu.matmul %393, %3, %cst_142 {dimension_numbers = #tpu.dot_dimension_numbers<[1], [0], [0], [1], [0, 0, 1, 1], [], []>} : vector<8x32xf32>, vector<32x128xf32>, vector<8x128xf32> -> vector<8x128xf32>
    %395 = arith.addf %369, %394 : vector<8x128xf32>
    %396 = math.tanh %395 : vector<8x128xf32>
    %397 = vector.extract_strided_slice %396 {offsets = [0, 0], sizes = [8, 32], strides = [1, 1]} : vector<8x128xf32> to vector<8x32xf32>
    %cst_143 = arith.constant 5.000000e-01 : f32
    %398 = vector.broadcast %cst_143 : f32 to vector<8x32xf32>
    %399 = arith.mulf %398, %397 : vector<8x32xf32>
    %cst_144 = arith.constant 5.000000e-01 : f32
    %400 = vector.broadcast %cst_144 : f32 to vector<8x32xf32>
    %401 = arith.addf %399, %400 : vector<8x32xf32>
    %402 = vector.extract_strided_slice %396 {offsets = [0, 32], sizes = [8, 32], strides = [1, 1]} : vector<8x128xf32> to vector<8x32xf32>
    %cst_145 = arith.constant 5.000000e-01 : f32
    %403 = vector.broadcast %cst_145 : f32 to vector<8x32xf32>
    %404 = arith.mulf %403, %402 : vector<8x32xf32>
    %cst_146 = arith.constant 5.000000e-01 : f32
    %405 = vector.broadcast %cst_146 : f32 to vector<8x32xf32>
    %406 = arith.addf %404, %405 : vector<8x32xf32>
    %407 = vector.extract_strided_slice %396 {offsets = [0, 64], sizes = [8, 32], strides = [1, 1]} : vector<8x128xf32> to vector<8x32xf32>
    %408 = vector.extract_strided_slice %396 {offsets = [0, 96], sizes = [8, 32], strides = [1, 1]} : vector<8x128xf32> to vector<8x32xf32>
    %cst_147 = arith.constant 5.000000e-01 : f32
    %409 = vector.broadcast %cst_147 : f32 to vector<8x32xf32>
    %410 = arith.mulf %409, %408 : vector<8x32xf32>
    %cst_148 = arith.constant 5.000000e-01 : f32
    %411 = vector.broadcast %cst_148 : f32 to vector<8x32xf32>
    %412 = arith.addf %410, %411 : vector<8x32xf32>
    %413 = arith.mulf %406, %358 : vector<8x32xf32>
    %414 = arith.mulf %401, %407 : vector<8x32xf32>
    %415 = arith.addf %413, %414 : vector<8x32xf32>
    %416 = math.tanh %415 : vector<8x32xf32>
    %417 = arith.mulf %412, %416 : vector<8x32xf32>
    %418 = arith.index_cast %364 : i32 to index
    %c0_149 = arith.constant 0 : index
    %419 = vector.load %arg9[%418, %c0_149] : memref<64x32xf32, #tpu.memory_space<vmem>>, vector<8x32xf32>
    tpu.vector_store %arg9[%418, %c0_149], %417 {strides = array<i32>} : memref<64x32xf32, #tpu.memory_space<vmem>>, vector<8x32xf32>,
    %c7_i32 = arith.constant 7 : i32
    %c8_i32_150 = arith.constant 8 : i32
    %420 = arith.muli %c7_i32, %c8_i32_150 : i32
    %421 = tpu.assume_multiple %420, 8 : i32
    %422 = arith.index_cast %421 : i32 to index
    %c0_151 = arith.constant 0 : index
    %423 = vector.load %arg10[%422, %c0_151] : memref<64x128xf32, #tpu.memory_space<vmem>>, vector<8x128xf32>
    %cst_152 = arith.constant dense<0.000000e+00> : vector<8x128xf32>
    %424 = tpu.matmul %417, %4, %cst_152 {dimension_numbers = #tpu.dot_dimension_numbers<[1], [0], [0], [1], [0, 0, 1, 1], [], []>} : vector<8x32xf32>, vector<32x128xf32>, vector<8x128xf32> -> vector<8x128xf32>
    %425 = vector.broadcast %5 : vector<1x128xf32> to vector<8x128xf32>
    %426 = arith.addf %424, %425 : vector<8x128xf32>
    %cst_153 = arith.constant dense<0.000000e+00> : vector<8x128xf32>
    %427 = tpu.matmul %393, %1, %cst_153 {dimension_numbers = #tpu.dot_dimension_numbers<[1], [0], [0], [1], [0, 0, 1, 1], [], []>} : vector<8x32xf32>, vector<32x128xf32>, vector<8x128xf32> -> vector<8x128xf32>
    %428 = arith.addf %427, %423 : vector<8x128xf32>
    %429 = math.tanh %428 : vector<8x128xf32>
    %430 = vector.extract_strided_slice %429 {offsets = [0, 0], sizes = [8, 32], strides = [1, 1]} : vector<8x128xf32> to vector<8x32xf32>
    %cst_154 = arith.constant 5.000000e-01 : f32
    %431 = vector.broadcast %cst_154 : f32 to vector<8x32xf32>
    %432 = arith.mulf %431, %430 : vector<8x32xf32>
    %cst_155 = arith.constant 5.000000e-01 : f32
    %433 = vector.broadcast %cst_155 : f32 to vector<8x32xf32>
    %434 = arith.addf %432, %433 : vector<8x32xf32>
    %435 = vector.extract_strided_slice %429 {offsets = [0, 32], sizes = [8, 32], strides = [1, 1]} : vector<8x128xf32> to vector<8x32xf32>
    %cst_156 = arith.constant 5.000000e-01 : f32
    %436 = vector.broadcast %cst_156 : f32 to vector<8x32xf32>
    %437 = arith.mulf %436, %435 : vector<8x32xf32>
    %cst_157 = arith.constant 5.000000e-01 : f32
    %438 = vector.broadcast %cst_157 : f32 to vector<8x32xf32>
    %439 = arith.addf %437, %438 : vector<8x32xf32>
    %440 = vector.extract_strided_slice %429 {offsets = [0, 64], sizes = [8, 32], strides = [1, 1]} : vector<8x128xf32> to vector<8x32xf32>
    %441 = vector.extract_strided_slice %429 {offsets = [0, 96], sizes = [8, 32], strides = [1, 1]} : vector<8x128xf32> to vector<8x32xf32>
    %cst_158 = arith.constant 5.000000e-01 : f32
    %442 = vector.broadcast %cst_158 : f32 to vector<8x32xf32>
    %443 = arith.mulf %442, %441 : vector<8x32xf32>
    %cst_159 = arith.constant 5.000000e-01 : f32
    %444 = vector.broadcast %cst_159 : f32 to vector<8x32xf32>
    %445 = arith.addf %443, %444 : vector<8x32xf32>
    %446 = arith.mulf %439, %391 : vector<8x32xf32>
    %447 = arith.mulf %434, %440 : vector<8x32xf32>
    %448 = arith.addf %446, %447 : vector<8x32xf32>
    %449 = math.tanh %448 : vector<8x32xf32>
    %450 = arith.mulf %445, %449 : vector<8x32xf32>
    %cst_160 = arith.constant dense<0.000000e+00> : vector<8x128xf32>
    %451 = tpu.matmul %450, %3, %cst_160 {dimension_numbers = #tpu.dot_dimension_numbers<[1], [0], [0], [1], [0, 0, 1, 1], [], []>} : vector<8x32xf32>, vector<32x128xf32>, vector<8x128xf32> -> vector<8x128xf32>
    %452 = arith.addf %426, %451 : vector<8x128xf32>
    %453 = math.tanh %452 : vector<8x128xf32>
    %454 = vector.extract_strided_slice %453 {offsets = [0, 0], sizes = [8, 32], strides = [1, 1]} : vector<8x128xf32> to vector<8x32xf32>
    %cst_161 = arith.constant 5.000000e-01 : f32
    %455 = vector.broadcast %cst_161 : f32 to vector<8x32xf32>
    %456 = arith.mulf %455, %454 : vector<8x32xf32>
    %cst_162 = arith.constant 5.000000e-01 : f32
    %457 = vector.broadcast %cst_162 : f32 to vector<8x32xf32>
    %458 = arith.addf %456, %457 : vector<8x32xf32>
    %459 = vector.extract_strided_slice %453 {offsets = [0, 32], sizes = [8, 32], strides = [1, 1]} : vector<8x128xf32> to vector<8x32xf32>
    %cst_163 = arith.constant 5.000000e-01 : f32
    %460 = vector.broadcast %cst_163 : f32 to vector<8x32xf32>
    %461 = arith.mulf %460, %459 : vector<8x32xf32>
    %cst_164 = arith.constant 5.000000e-01 : f32
    %462 = vector.broadcast %cst_164 : f32 to vector<8x32xf32>
    %463 = arith.addf %461, %462 : vector<8x32xf32>
    %464 = vector.extract_strided_slice %453 {offsets = [0, 64], sizes = [8, 32], strides = [1, 1]} : vector<8x128xf32> to vector<8x32xf32>
    %465 = vector.extract_strided_slice %453 {offsets = [0, 96], sizes = [8, 32], strides = [1, 1]} : vector<8x128xf32> to vector<8x32xf32>
    %cst_165 = arith.constant 5.000000e-01 : f32
    %466 = vector.broadcast %cst_165 : f32 to vector<8x32xf32>
    %467 = arith.mulf %466, %465 : vector<8x32xf32>
    %cst_166 = arith.constant 5.000000e-01 : f32
    %468 = vector.broadcast %cst_166 : f32 to vector<8x32xf32>
    %469 = arith.addf %467, %468 : vector<8x32xf32>
    %470 = arith.mulf %463, %415 : vector<8x32xf32>
    %471 = arith.mulf %458, %464 : vector<8x32xf32>
    %472 = arith.addf %470, %471 : vector<8x32xf32>
    %473 = math.tanh %472 : vector<8x32xf32>
    %474 = arith.mulf %469, %473 : vector<8x32xf32>
    %475 = arith.index_cast %421 : i32 to index
    %c0_167 = arith.constant 0 : index
    %476 = vector.load %arg9[%475, %c0_167] : memref<64x32xf32, #tpu.memory_space<vmem>>, vector<8x32xf32>
    tpu.vector_store %arg9[%475, %c0_167], %474 {strides = array<i32>} : memref<64x32xf32, #tpu.memory_space<vmem>>, vector<8x32xf32>,
    %c8_i32_168 = arith.constant 8 : i32
    return
  }
}

</mosaic_0001>

<bundles_post_ra>
// kernel: tpu_custom_call.1
= control target key start
LH: loop header
LB: loop body
LE: loop exit
PB: predicated region body
PF: predicated region fallthrough
CT: control target
= control target key end

     0   :  { %14 = vsyncpa [#allocation4], 0  ;;  %s3584_s0 = inlined_call_operand.vmem [shape: f32[64,1], index: 0, kind: input, shape index: {}]   ;;  %s3585_s1 = inlined_call_operand.hbm [shape: f32[2,8,32], index: 1, kind: input, shape index: {}]   ;;  %s3586_s2 = inlined_call_operand.hbm [shape: f32[2,8,32], index: 2, kind: input, shape index: {}]   ;;  %s3587_s3 = inlined_call_operand.vmem [shape: f32[1,128], index: 3, kind: input, shape index: {}]   ;;  %s3588_s4 = inlined_call_operand.vmem [shape: f32[32,128], index: 4, kind: input, shape index: {}]   ;;  %s3589_s5 = inlined_call_operand.vmem [shape: f32[1,128], index: 5, kind: input, shape index: {}]   ;;  %s3590_s6 = inlined_call_operand.vmem [shape: f32[32,128], index: 6, kind: input, shape index: {}]   ;;  %s3591_s7 = inlined_call_operand.hbm [shape: f32[32,128], index: 7, kind: input, shape index: {}]   ;;  %s3592_s8 = inlined_call_operand.vmem [shape: f32[1,128], index: 8, kind: input, shape index: {}]   ;;  %s3593_s9 = inlined_call_operand.vmem [shape: f32[64,32], index: 9, kind: output, shape index: {}]  }
   0x1   :  { %15 = vsyncpa [#allocation6], 0  ;;  %s3062_s30 = smov [#allocation5]   ;;  %s3063_s11 = smov [#allocation3]  }
   0x2   :  { %s35_s10 = sshll.u32 %s3062_s30, 4  ;;  %s23_s12 = sshll.u32 %s3063_s11, 4  ;;  %s36_s10 = int_to_ptr.vmem [resolvable:$true] %s35_s10  ;;  %s3123_s12 = int_to_ptr.vmem [resolvable:$true] %s23_s12 }
   0x3   :  { %s2992_s15 = scalar_lea.hbm %s3586_s2, 256 }
   0x4   :  { %p2993_p0 = scmp.ne.s32.totalorder %s3586_s2, %s2992_s15  ;;  %p2996_p1 = scmp.lt.u32.totalorder %s2992_s15, %s3586_s2 }
   0x6   :  { %p2998_p2 = pnand %p2996_p1, %p2993_p0 }
   0x8   :  { %3001 = shalt.err (!%p2998_p2)
}
   0x9   :  { %s3002_s20 = scalar_lea.vmem %s36_s10, 256  ;;  %p3007_p4 = scmp.lt.s32.totalorder %s36_s10, %s36_s10 }
   0xa   :  { %p3003_p3 = scmp.ne.s32.totalorder %s36_s10, %s3002_s20  ;;  %p3008_p5 = scmp.lt.s32.totalorder %s3002_s20, %s3002_s20 }
   0xc   :  { %p3009_p6 = por %p3008_p5, %p3007_p4 }
   0xe   :  { %p3010_p7 = pnand %p3009_p6, %p3003_p3 }
  0x10   :  { %3013 = shalt.err (!%p3010_p7)
}
  0x11   :  { %s3064_s21 = smov 128   ;;  %s3065_s22 = smov 8  }
  0x12   :  { %41 = dma.hbm_to_vmem [thread:$0]  %s3586_s2, 256, %s36_s10, [#allocation6], %s3064_s21, %s3064_s21, %s3065_s22  }
  0x13   :  { %s3014_s27 = scalar_lea.hbm %s3585_s1, 256 }
  0x14   :  { %p3015_p8 = scmp.ne.s32.totalorder %s3585_s1, %s3014_s27  ;;  %p3018_p9 = scmp.lt.u32.totalorder %s3014_s27, %s3585_s1 }
  0x16   :  { %p3020_p10 = pnand %p3018_p9, %p3015_p8 }
  0x18   :  { %3023 = shalt.err (!%p3020_p10)
}
  0x19   :  { %s3024_s13 = scalar_lea.vmem %s3123_s12, 256  ;;  %p3029_p12 = scmp.lt.s32.totalorder %s3123_s12, %s3123_s12 }
  0x1a   :  { %p3025_p11 = scmp.ne.s32.totalorder %s3123_s12, %s3024_s13  ;;  %p3030_p13 = scmp.lt.s32.totalorder %s3024_s13, %s3024_s13 }
  0x1c   :  { %p3031_p0 = por %p3030_p13, %p3029_p12 }
  0x1e   :  { %p3032_p1 = pnand %p3031_p0, %p3025_p11 }
  0x20   :  { %3035 = shalt.err (!%p3032_p1)
}
  0x21   :  { %29 = dma.hbm_to_vmem [thread:$0]  %s3585_s1, 256, %s3123_s12, [#allocation4], %s3064_s21, %s3064_s21, %s3065_s22  }
  0x22   :  { %s3066_s14 = smov [#allocation7]   ;;  %s3036_s18 = scalar_lea.hbm %s3591_s7, 512 }
  0x23   :  { %s55_s15 = sshll.u32 %s3066_s14, 4  ;;  %p3037_p2 = scmp.ne.s32.totalorder %s3591_s7, %s3036_s18  ;;  %s56_s15 = int_to_ptr.vmem [resolvable:$true] %s55_s15 }
  0x24   :  { %p3040_p3 = scmp.lt.u32.totalorder %s3036_s18, %s3591_s7 }
  0x26   :  { %p3042_p4 = pnand %p3040_p3, %p3037_p2 }
  0x28   :  { %3045 = shalt.err (!%p3042_p4)
}
  0x29   :  { %s3046_s25 = scalar_lea.vmem %s56_s15, 512  ;;  %p3051_p6 = scmp.lt.s32.totalorder %s56_s15, %s56_s15 }
  0x2a   :  { %p3047_p5 = scmp.ne.s32.totalorder %s56_s15, %s3046_s25  ;;  %p3052_p7 = scmp.lt.s32.totalorder %s3046_s25, %s3046_s25 }
  0x2c   :  { %p3053_p8 = por %p3052_p7, %p3051_p6 }
  0x2e   :  { %p3054_p9 = pnand %p3053_p8, %p3047_p5 }
  0x30   :  { %3057 = shalt.err (!%p3054_p9)
}
  0x31   :  { %61 = dma.hbm_to_vmem [thread:$0]  %s3591_s7, 512, %s56_s15, [#allocation6], %s3064_s21, %s3064_s21, %s3065_s22  }
  0x32   :  { %3058 = dma.done.wait [#allocation4], 256  }
  0x33   :  { %3059 = vsyncadd [#allocation4], 4294967040 }
  0x34   :  { %3060 = dma.done.wait [#allocation6], 768  }
  0x35   :  { %3061 = vsyncadd [#allocation6], 4294966528  ;;  %v3067_v0 = vmov 0.0|0.0   ;;  %vm3068_vm0 = vmmov 0   ;;  %v3069_v1 = vmov 0.0   ;;  %v3070_v2 = vmov 0  }
  0x36   :  { %2753 = vmatprep.subr.bf16.mxu1 %v3067_v0  ;;  %2502 = vmatprep.mubr.msk.f32.mxu1 %vm3068_vm0, %v3069_v1  ;;  %v74_v3 = vld [vmem:[%s3588_s4] sm:$0xff]  ;;  %v75_v4 = vld [vmem:[%s3588_s4 + $0x8] sm:$0xff]  ;;  %v76_v5 = vld [vmem:[%s3588_s4 + $0x10] sm:$0xff]  ;;  %s3071_s2 = smov 32   ;;  %vm185_vm1 = vcmask 261120   ;;  %s3072_s16 = smov 64  }
  0x37   :  { %2926 = vset.pattern.permute.xlu0 %v3070_v2  ;;  %2747 = vmatprep.subr.bf16.mxu0 %v3067_v0  ;;  %v3190_v6 = vpack.c.bf16 %v75_v4, %v74_v3  ;;  %v77_v7 = vld [vmem:[%s3588_s4 + $0x18] sm:$0xff]  ;;  %v88_v8 = vld [vmem:[%s3584_s0] sm:$0xff]  ;;  %v173_v9 = vld [vmem:[#allocation5] sm:$0xff] }
  0x38   :  { %2491 = vmatprep.mubr.msk.f32.mxu0 %vm3068_vm0, %v3069_v1  ;;  %2927 = vset.pattern.permute.xlu1 %v3070_v2  ;;  %v3199_v10 = vpack.c.bf16 %v77_v7, %v76_v5  ;;  %v172_v11 = vld [vmem:[#allocation3] sm:$0xff]  ;;  %v89_v30 = vld [vmem:[%s3584_s0 + $0x8] sm:$0xff]  ;;  %v85_v33 = vld [vmem:[#allocation7 + $0x10] sm:$0xff] }
  0x39   :  { %98 = vperm.xlu0 %2926, %v88_v8   ;;  %2755 = vmatpush3.bf16.msra.mxu1 %v3190_v6  ;;  %v3211_v13 = vld [vmem:[%s3587_s3] ss:$0 sm:$0xff]  ;;  %v84_v32 = vld [vmem:[#allocation7 + $0x8] sm:$0xff]  ;;  %v86_v35 = vld [vmem:[#allocation7 + $0x18] sm:$0xff] }
  0x3a   :  { %336 = vrot.lane.b32.xlu1 %v173_v9, %s3071_s2  ;;  %2756 = vmatprep.subr.bf16.mxu1 %v3067_v0  ;;  %v3217_v15 = vld [vmem:[%s3589_s5] ss:$0 sm:$0xff]  ;;  %v3232_v36 = vpack.c.bf16 %v86_v35, %v85_v33  ;;  %v80_v38 = vld [vmem:[%s3590_s6 + $0x8] sm:$0xff]  ;;  %v81_v41 = vld [vmem:[%s3590_s6 + $0x10] sm:$0xff] }
  0x3b   :  { %v83_v31 = vld [vmem:[#allocation7] sm:$0xff]  ;;  %v175_v39 = vld [vmem:[#allocation3 + $0x8] sm:$0xff]  ;;  %v82_v42 = vld [vmem:[%s3590_s6 + $0x18] sm:$0xff] }
  0x3c   :  { %v3229_v34 = vpack.c.bf16 %v84_v32, %v83_v31  ;;  %v79_v37 = vld [vmem:[%s3590_s6] sm:$0xff]  ;;  %v3257_v43 = vpack.c.bf16 %v82_v42, %v81_v41  ;;  %v177_v58 = vld [vmem:[#allocation5 + $0x8] sm:$0xff] }
  0x3d   :  { %2758 = vmatpush3.bf16.msra.mxu1 %v3199_v10  ;;  %v3244_v40 = vpack.c.bf16 %v80_v38, %v79_v37  ;;  %v3282_v47 = vld [vmem:[%s3592_s8] ss:$0 sm:$0xff] }
  0x3e   :  { %2765 = vmatprep.subr.bf16.mxu1 %v3067_v0  ;;  %2749 = vmatpush3.bf16.msra.mxu0 %v3229_v34 }
  0x3f   :  { %2750 = vmatprep.subr.bf16.mxu0 %v3067_v0 }
  0x40   :  { %2503 = vmatmul.mubr.msk.f32.vlgmr.msra.gmra.mrb[0].mxu1 %vm185_vm1, %v172_v11 }
  0x41   :  { %2524 = vmatprep.mubr.msk.f32.mxu1 %vm3068_vm0, %v3069_v1  ;;  %2767 = vmatpush3.bf16.msra.mxu1 %v3229_v34 }
  0x42   :  { %2768 = vmatprep.subr.bf16.mxu1 %v3067_v0  ;;  %2752 = vmatpush3.bf16.msra.mxu0 %v3232_v36 }
  0x43   :  { %2759 = vmatprep.subr.bf16.mxu0 %v3067_v0 }
  0x45   :  { %2770 = vmatpush3.bf16.msra.mxu1 %v3232_v36  ;;  %2492 = vmatmul.mubr.msk.f32.vlgmr.msra.gmra.mrb[0].mxu0 %vm185_vm1, %v175_v39 }
  0x46   :  { %2777 = vmatprep.subr.bf16.mxu1 %v3067_v0  ;;  %2761 = vmatpush3.bf16.msra.mxu0 %v3244_v40 }
  0x47   :  { %2513 = vmatprep.mubr.msk.f32.mxu0 %vm3068_vm0, %v3069_v1  ;;  %2762 = vmatprep.subr.bf16.mxu0 %v3067_v0 }
  0x4a   :  { %2764 = vmatpush3.bf16.msra.mxu0 %v3257_v43 }
  0x4b   :  { %2771 = vmatprep.subr.bf16.mxu0 %v3067_v0 }
  0xac   :  { %v337_v25 = vpop.permute.xlu1 %336 }
  0xb8   :  { %v99_v12 = vpop.permute.xlu0 %98 }
  0xb9   :  { %v142_v14 = vmul.f32 %v3211_v13, %v99_v12 }
  0xbb   :  { %v156_v16 = vadd.f32 %v3217_v15, %v142_v14 }
 0x113   :  { %v328_v17 = vpop.f32.mrb[0].mxu1 }
 0x114   :  { %v329_v18 = vadd.f32 %v328_v17, %v156_v16  ;;  %v2504_v19 = vpop.f32.mrb[1].mxu1 }
 0x116   :  { %2928 = vtanh.f32 %v329_v18 }
 0x120   :  { %v2929_v20 = vpop.eup %2928 }
 0x121   :  { %341 = vrot.lane.b32.xlu0 %v2929_v20, %s3072_s16  ;;  %v333_v21 = vmul.f32 0.5, %v2929_v20 }
 0x123   :  { %v334_v22 = vadd.f32 0.5, %v333_v21  ;;  %v90_v21 = vld [vmem:[%s3584_s0 + $0x10] sm:$0xff] }
 0x125   :  { %v339_v26 = vmul.f32 %v337_v25, %v334_v22 }
 0x193   :  { %v342_v23 = vpop.permute.xlu0 %341 }
 0x194   :  { %v344_v24 = vmul.f32 %v342_v23, %v334_v22 }
 0x196   :  { %346 = vrot.lane.b32.xlu1 %v344_v24, %s3071_s2 }
 0x208   :  { %v347_v27 = vpop.permute.xlu1 %346 }
 0x209   :  { %v3222_v28 = vadd.f32 %v347_v27, %v339_v26 }
 0x20b   :  { %2930 = vtanh.f32 %v3222_v28 }
 0x215   :  { %v2931_v29 = vpop.eup %2930 }
 0x216   :  { %352 = vrot.lane.b32.xlu0 %v2931_v29, %s3072_s16 }
 0x21a   :  { %103 = vperm.xlu0 %2926, %v89_v30  }
 0x288   :  { %v353_v44 = vpop.permute.xlu0 %352 }
 0x289   :  { %v355_v45 = vmul.f32 %v353_v44, %v334_v22 }
 0x28b   :  { %357 = vrot.lane.b32.xlu1 %v355_v45, %s3071_s2 }
 0x299   :  { %v104_v48 = vpop.permute.xlu0 %103 }
 0x29a   :  { %v143_v52 = vmul.f32 %v3211_v13, %v104_v48 }
 0x29c   :  { %v157_v53 = vadd.f32 %v3217_v15, %v143_v52 }
 0x2fd   :  { %v358_v46 = vpop.permute.xlu1 %357 }
 0x2fe   :  { %2514 = vmatmul.mubr.msk.f32.vlgmr.msra.gmra.mrb[0].mxu0 %vm185_vm1, %v358_v46 }
 0x2ff   :  { %2773 = vmatpush3.bf16.msra.mxu0 %v3190_v6  ;;  %2535 = vmatprep.mubr.msk.f32.mxu0 %vm3068_vm0, %v3069_v1 }
 0x300   :  { %2774 = vmatprep.subr.bf16.mxu0 %v3067_v0 }
 0x303   :  { %2776 = vmatpush3.bf16.msra.mxu0 %v3199_v10 }
 0x304   :  { %2783 = vmatprep.subr.bf16.mxu0 %v3067_v0 }
 0x306   :  { %2536 = vmatmul.mubr.msk.f32.vlgmr.msra.gmra.mrb[2].mxu0 %vm185_vm1, %v358_v46 }
 0x307   :  { %2785 = vmatpush3.bf16.msra.mxu0 %v3229_v34  ;;  %2557 = vmatprep.mubr.msk.f32.mxu0 %vm3068_vm0, %v3069_v1 }
 0x308   :  { %2786 = vmatprep.subr.bf16.mxu0 %v3067_v0 }
 0x30b   :  { %2788 = vmatpush3.bf16.msra.mxu0 %v3232_v36 }
 0x30c   :  { %2795 = vmatprep.subr.bf16.mxu0 %v3067_v0 }
 0x3d1   :  { %v427_v49 = vpop.f32.mrb[0].mxu0 }
 0x3d2   :  { %v2891_v50 = vadd.f32 %v3282_v47, %v427_v49  ;;  %v2515_v51 = vpop.f32.mrb[1].mxu0 }
 0x3d4   :  { %2932 = vtanh.f32 %v2891_v50 }
 0x3d9   :  { %v601_v54 = vpop.f32.mrb[2].mxu0 }
 0x3da   :  { %v602_v55 = vadd.f32 %v601_v54, %v157_v53  ;;  %v2537_v56 = vpop.f32.mrb[3].mxu0 }
 0x3dc   :  { %2934 = vtanh.f32 %v602_v55 }
 0x3de   :  { %v2933_v57 = vpop.eup %2932 }
 0x3df   :  { %441 = vrot.lane.b32.xlu1 %v2933_v57, %s3072_s16  ;;  %v433_v60 = vmul.f32 0.5, %v2933_v57 }
 0x3e1   :  { %v434_v61 = vadd.f32 0.5, %v433_v60  ;;  %v91_v60 = vld [vmem:[%s3584_s0 + $0x18] sm:$0xff] }
 0x3e3   :  { %436 = vrot.lane.b32.xlu1 %v177_v58, %s3071_s2 }
 0x3e6   :  { %v2935_v59 = vpop.eup %2934 }
 0x3e7   :  { %610 = vrot.lane.b32.xlu0 %v2935_v59, %s3072_s16  ;;  %v606_v2 = vmul.f32 0.5, %v2935_v59 }
 0x3e9   :  { %v607_v3 = vadd.f32 0.5, %v606_v2 }
 0x3eb   :  { %v608_v12 = vmul.f32 %v607_v3, %v3222_v28 }
 0x451   :  { %v442_v62 = vpop.permute.xlu1 %441 }
 0x452   :  { %v444_v63 = vmul.f32 %v442_v62, %v434_v61 }
 0x454   :  { %446 = vrot.lane.b32.xlu0 %v444_v63, %s3071_s2 }
 0x455   :  { %v437_v7 = vpop.permute.xlu1 %436 }
 0x456   :  { %v439_v8 = vmul.f32 %v437_v7, %v434_v61 }
 0x459   :  { %v611_v4 = vpop.permute.xlu0 %610 }
 0x45a   :  { %v613_v5 = vmul.f32 %v611_v4, %v607_v3 }
 0x45c   :  { %615 = vrot.lane.b32.xlu1 %v613_v5, %s3071_s2 }
 0x4c6   :  { %v447_v9 = vpop.permute.xlu0 %446 }
 0x4c7   :  { %v3292_v11 = vadd.f32 %v447_v9, %v439_v8 }
 0x4c9   :  { %2936 = vtanh.f32 %v3292_v11 }
 0x4ce   :  { %v616_v14 = vpop.permute.xlu1 %615 }
 0x4cf   :  { %v3296_v16 = vadd.f32 %v616_v14, %v608_v12 }
 0x4d1   :  { %2938 = vtanh.f32 %v3296_v16 }
 0x4d3   :  { %v2937_v17 = vpop.eup %2936 }
 0x4d4   :  { %452 = vrot.lane.b32.xlu0 %v2937_v17, %s3072_s16 }
 0x4db   :  { %v2939_v18 = vpop.eup %2938 }
 0x4dc   :  { %621 = vrot.lane.b32.xlu1 %v2939_v18, %s3072_s16 }
 0x546   :  { %v453_v19 = vpop.permute.xlu0 %452 }
 0x547   :  { %v455_v20 = vmul.f32 %v453_v19, %v434_v61 }
 0x549   :  { %457 = vrot.lane.b32.xlu0 %v455_v20, %s3071_s2 }
 0x54d   :  { %108 = vperm.xlu0 %2926, %v90_v21  }
 0x54e   :  { %v622_v22 = vpop.permute.xlu1 %621 }
 0x54f   :  { %v624_v23 = vmul.f32 %v622_v22, %v607_v3 }
 0x551   :  { %626 = vrot.lane.b32.xlu1 %v624_v23, %s3071_s2 }
 0x5bb   :  { %v458_v24 = vpop.permute.xlu0 %457 }
 0x5bc   :  { %460 = vst.msk [vmem:[%s3593_s9] sm:$0xff] %vm185_vm1, %v458_v24  ;;  %2525 = vmatmul.mubr.msk.f32.vlgmr.msra.gmra.mrb[2].mxu1 %vm185_vm1, %v458_v24 }
 0x5bd   :  { %2779 = vmatpush3.bf16.msra.mxu1 %v3244_v40  ;;  %2546 = vmatprep.mubr.msk.f32.mxu1 %vm3068_vm0, %v3069_v1 }
 0x5be   :  { %2780 = vmatprep.subr.bf16.mxu1 %v3067_v0 }
 0x5c1   :  { %2782 = vmatpush3.bf16.msra.mxu1 %v3257_v43 }
 0x5c2   :  { %2789 = vmatprep.subr.bf16.mxu1 %v3067_v0 }
 0x5c3   :  { %v627_v25 = vpop.permute.xlu1 %626 }
 0x5c4   :  { %2547 = vmatmul.mubr.msk.f32.vlgmr.msra.gmra.mrb[2].mxu1 %vm185_vm1, %v627_v25 }
 0x5c5   :  { %2791 = vmatpush3.bf16.msra.mxu1 %v3190_v6  ;;  %2568 = vmatprep.mubr.msk.f32.mxu1 %vm3068_vm0, %v3069_v1 }
 0x5c6   :  { %2792 = vmatprep.subr.bf16.mxu1 %v3067_v0 }
 0x5c9   :  { %2794 = vmatpush3.bf16.msra.mxu1 %v3199_v10 }
 0x5ca   :  { %2801 = vmatprep.subr.bf16.mxu1 %v3067_v0 }
 0x5cc   :  { %2569 = vmatmul.mubr.msk.f32.vlgmr.msra.gmra.mrb[4].mxu1 %vm185_vm1, %v627_v25  ;;  %v109_v26 = vpop.permute.xlu0 %108 }
 0x5cd   :  { %2803 = vmatpush3.bf16.msra.mxu1 %v3229_v34  ;;  %2590 = vmatprep.mubr.msk.f32.mxu1 %vm3068_vm0, %v3069_v1  ;;  %v144_v30 = vmul.f32 %v3211_v13, %v109_v26 }
 0x5ce   :  { %2804 = vmatprep.subr.bf16.mxu1 %v3067_v0 }
 0x5cf   :  { %v158_v31 = vadd.f32 %v3217_v15, %v144_v30 }
 0x5d1   :  { %2806 = vmatpush3.bf16.msra.mxu1 %v3232_v36 }
 0x5d2   :  { %2813 = vmatprep.subr.bf16.mxu1 %v3067_v0 }
 0x697   :  { %v696_v27 = vpop.f32.mrb[2].mxu1 }
 0x698   :  { %v2892_v28 = vadd.f32 %v3282_v47, %v696_v27  ;;  %v2548_v29 = vpop.f32.mrb[3].mxu1 }
 0x69a   :  { %2940 = vtanh.f32 %v2892_v28 }
 0x69f   :  { %v867_v32 = vpop.f32.mrb[4].mxu1 }
 0x6a0   :  { %v868_v33 = vadd.f32 %v867_v32, %v158_v31  ;;  %v2570_v35 = vpop.f32.mrb[5].mxu1 }
 0x6a2   :  { %2942 = vtanh.f32 %v868_v33 }
 0x6a4   :  { %v2941_v37 = vpop.eup %2940 }
 0x6a5   :  { %706 = vrot.lane.b32.xlu1 %v2941_v37, %s3072_s16  ;;  %v702_v39 = vmul.f32 0.5, %v2941_v37 }
 0x6a7   :  { %v703_v41 = vadd.f32 0.5, %v702_v39 }
 0x6a9   :  { %v704_v50 = vmul.f32 %v703_v41, %v3292_v11 }
 0x6ac   :  { %v2943_v38 = vpop.eup %2942 }
 0x6ad   :  { %876 = vrot.lane.b32.xlu0 %v2943_v38, %s3072_s16  ;;  %v872_v45 = vmul.f32 0.5, %v2943_v38  ;;  %v92_v38 = vld [vmem:[%s3584_s0 + $0x20] sm:$0xff] }
 0x6af   :  { %v873_v46 = vadd.f32 0.5, %v872_v45 }
 0x6b1   :  { %v874_v53 = vmul.f32 %v873_v46, %v3296_v16 }
 0x717   :  { %v707_v42 = vpop.permute.xlu1 %706 }
 0x718   :  { %v709_v44 = vmul.f32 %v707_v42, %v703_v41 }
 0x71a   :  { %711 = vrot.lane.b32.xlu1 %v709_v44, %s3071_s2 }
 0x71f   :  { %v877_v48 = vpop.permute.xlu0 %876 }
 0x720   :  { %v879_v49 = vmul.f32 %v877_v48, %v873_v46 }
 0x722   :  { %881 = vrot.lane.b32.xlu0 %v879_v49, %s3071_s2 }
 0x78c   :  { %v712_v51 = vpop.permute.xlu1 %711 }
 0x78d   :  { %v3339_v52 = vadd.f32 %v712_v51, %v704_v50 }
 0x78f   :  { %2944 = vtanh.f32 %v3339_v52 }
 0x794   :  { %v882_v54 = vpop.permute.xlu0 %881 }
 0x795   :  { %v3343_v55 = vadd.f32 %v882_v54, %v874_v53 }
 0x797   :  { %2946 = vtanh.f32 %v3343_v55 }
 0x799   :  { %v2945_v56 = vpop.eup %2944 }
 0x79a   :  { %717 = vrot.lane.b32.xlu1 %v2945_v56, %s3072_s16 }
 0x7a1   :  { %v2947_v57 = vpop.eup %2946 }
 0x7a2   :  { %887 = vrot.lane.b32.xlu0 %v2947_v57, %s3072_s16 }
 0x80c   :  { %v718_v58 = vpop.permute.xlu1 %717 }
 0x80d   :  { %v720_v59 = vmul.f32 %v718_v58, %v703_v41 }
 0x80f   :  { %722 = vrot.lane.b32.xlu1 %v720_v59, %s3071_s2 }
 0x813   :  { %113 = vperm.xlu1 %2927, %v91_v60  }
 0x814   :  { %v888_v61 = vpop.permute.xlu0 %887 }
 0x815   :  { %v890_v62 = vmul.f32 %v888_v61, %v873_v46 }
 0x817   :  { %892 = vrot.lane.b32.xlu0 %v890_v62, %s3071_s2 }
 0x881   :  { %v723_v63 = vpop.permute.xlu1 %722 }
 0x882   :  { %2338 = vst.msk [vmem:[%s3593_s9 + $0x8] sm:$0xff] %vm185_vm1, %v723_v63  ;;  %2558 = vmatmul.mubr.msk.f32.vlgmr.msra.gmra.mrb[4].mxu0 %vm185_vm1, %v723_v63 }
 0x883   :  { %2797 = vmatpush3.bf16.msra.mxu0 %v3244_v40  ;;  %2579 = vmatprep.mubr.msk.f32.mxu0 %vm3068_vm0, %v3069_v1 }
 0x884   :  { %2798 = vmatprep.subr.bf16.mxu0 %v3067_v0 }
 0x887   :  { %2800 = vmatpush3.bf16.msra.mxu0 %v3257_v43 }
 0x888   :  { %2807 = vmatprep.subr.bf16.mxu0 %v3067_v0 }
 0x889   :  { %v893_v2 = vpop.permute.xlu0 %892 }
 0x88a   :  { %2580 = vmatmul.mubr.msk.f32.vlgmr.msra.gmra.mrb[4].mxu0 %vm185_vm1, %v893_v2 }
 0x88b   :  { %2809 = vmatpush3.bf16.msra.mxu0 %v3190_v6  ;;  %2601 = vmatprep.mubr.msk.f32.mxu0 %vm3068_vm0, %v3069_v1 }
 0x88c   :  { %2810 = vmatprep.subr.bf16.mxu0 %v3067_v0 }
 0x88f   :  { %2812 = vmatpush3.bf16.msra.mxu0 %v3199_v10 }
 0x890   :  { %2819 = vmatprep.subr.bf16.mxu0 %v3067_v0 }
 0x892   :  { %2602 = vmatmul.mubr.msk.f32.vlgmr.msra.gmra.mrb[6].mxu0 %vm185_vm1, %v893_v2  ;;  %v114_v3 = vpop.permute.xlu1 %113 }
 0x893   :  { %2821 = vmatpush3.bf16.msra.mxu0 %v3229_v34  ;;  %2623 = vmatprep.mubr.msk.f32.mxu0 %vm3068_vm0, %v3069_v1  ;;  %v145_v8 = vmul.f32 %v3211_v13, %v114_v3 }
 0x894   :  { %2822 = vmatprep.subr.bf16.mxu0 %v3067_v0 }
 0x895   :  { %v159_v9 = vadd.f32 %v3217_v15, %v145_v8 }
 0x897   :  { %2824 = vmatpush3.bf16.msra.mxu0 %v3232_v36 }
 0x898   :  { %2831 = vmatprep.subr.bf16.mxu0 %v3067_v0 }
 0x95d   :  { %v962_v4 = vpop.f32.mrb[4].mxu0 }
 0x95e   :  { %v2893_v5 = vadd.f32 %v3282_v47, %v962_v4  ;;  %v2581_v7 = vpop.f32.mrb[5].mxu0 }
 0x960   :  { %2948 = vtanh.f32 %v2893_v5 }
 0x965   :  { %v1133_v11 = vpop.f32.mrb[6].mxu0 }
 0x966   :  { %v1134_v12 = vadd.f32 %v1133_v11, %v159_v9  ;;  %v2603_v14 = vpop.f32.mrb[7].mxu0 }
 0x968   :  { %2950 = vtanh.f32 %v1134_v12 }
 0x96a   :  { %v2949_v16 = vpop.eup %2948 }
 0x96b   :  { %972 = vrot.lane.b32.xlu0 %v2949_v16, %s3072_s16  ;;  %v968_v18 = vmul.f32 0.5, %v2949_v16 }
 0x96d   :  { %v969_v19 = vadd.f32 0.5, %v968_v18 }
 0x96f   :  { %v970_v26 = vmul.f32 %v969_v19, %v3339_v52 }
 0x972   :  { %v2951_v17 = vpop.eup %2950 }
 0x973   :  { %1142 = vrot.lane.b32.xlu1 %v2951_v17, %s3072_s16  ;;  %v1138_v22 = vmul.f32 0.5, %v2951_v17  ;;  %v93_v17 = vld [vmem:[%s3584_s0 + $0x28] sm:$0xff] }
 0x975   :  { %v1139_v23 = vadd.f32 0.5, %v1138_v22 }
 0x977   :  { %v1140_v29 = vmul.f32 %v1139_v23, %v3343_v55 }
 0x9dd   :  { %v973_v20 = vpop.permute.xlu0 %972 }
 0x9de   :  { %v975_v21 = vmul.f32 %v973_v20, %v969_v19 }
 0x9e0   :  { %977 = vrot.lane.b32.xlu0 %v975_v21, %s3071_s2 }
 0x9e5   :  { %v1143_v24 = vpop.permute.xlu1 %1142 }
 0x9e6   :  { %v1145_v25 = vmul.f32 %v1143_v24, %v1139_v23 }
 0x9e8   :  { %1147 = vrot.lane.b32.xlu1 %v1145_v25, %s3071_s2 }
 0xa52   :  { %v978_v27 = vpop.permute.xlu0 %977 }
 0xa53   :  { %v3386_v28 = vadd.f32 %v978_v27, %v970_v26 }
 0xa55   :  { %2952 = vtanh.f32 %v3386_v28 }
 0xa5a   :  { %v1148_v30 = vpop.permute.xlu1 %1147 }
 0xa5b   :  { %v3390_v31 = vadd.f32 %v1148_v30, %v1140_v29 }
 0xa5d   :  { %2954 = vtanh.f32 %v3390_v31 }
 0xa5f   :  { %v2953_v32 = vpop.eup %2952 }
 0xa60   :  { %983 = vrot.lane.b32.xlu0 %v2953_v32, %s3072_s16 }
 0xa67   :  { %v2955_v33 = vpop.eup %2954 }
 0xa68   :  { %1153 = vrot.lane.b32.xlu1 %v2955_v33, %s3072_s16 }
 0xad2   :  { %v984_v35 = vpop.permute.xlu0 %983 }
 0xad3   :  { %v986_v37 = vmul.f32 %v984_v35, %v969_v19 }
 0xad5   :  { %988 = vrot.lane.b32.xlu0 %v986_v37, %s3071_s2 }
 0xad9   :  { %118 = vperm.xlu0 %2926, %v92_v38  }
 0xada   :  { %v1154_v39 = vpop.permute.xlu1 %1153 }
 0xadb   :  { %v1156_v41 = vmul.f32 %v1154_v39, %v1139_v23 }
 0xadd   :  { %1158 = vrot.lane.b32.xlu1 %v1156_v41, %s3071_s2 }
 0xb47   :  { %v989_v42 = vpop.permute.xlu0 %988 }
 0xb48   :  { %2342 = vst.msk [vmem:[%s3593_s9 + $0x10] sm:$0xff] %vm185_vm1, %v989_v42  ;;  %2591 = vmatmul.mubr.msk.f32.vlgmr.msra.gmra.mrb[6].mxu1 %vm185_vm1, %v989_v42 }
 0xb49   :  { %2815 = vmatpush3.bf16.msra.mxu1 %v3244_v40  ;;  %2612 = vmatprep.mubr.msk.f32.mxu1 %vm3068_vm0, %v3069_v1 }
 0xb4a   :  { %2816 = vmatprep.subr.bf16.mxu1 %v3067_v0 }
 0xb4d   :  { %2818 = vmatpush3.bf16.msra.mxu1 %v3257_v43 }
 0xb4e   :  { %2825 = vmatprep.subr.bf16.mxu1 %v3067_v0 }
 0xb4f   :  { %v1159_v44 = vpop.permute.xlu1 %1158 }
 0xb50   :  { %2613 = vmatmul.mubr.msk.f32.vlgmr.msra.gmra.mrb[6].mxu1 %vm185_vm1, %v1159_v44 }
 0xb51   :  { %2827 = vmatpush3.bf16.msra.mxu1 %v3190_v6  ;;  %2634 = vmatprep.mubr.msk.f32.mxu1 %vm3068_vm0, %v3069_v1 }
 0xb52   :  { %2828 = vmatprep.subr.bf16.mxu1 %v3067_v0 }
 0xb55   :  { %2830 = vmatpush3.bf16.msra.mxu1 %v3199_v10 }
 0xb56   :  { %2837 = vmatprep.subr.bf16.mxu1 %v3067_v0 }
 0xb58   :  { %2635 = vmatmul.mubr.msk.f32.vlgmr.msra.gmra.mrb[8].mxu1 %vm185_vm1, %v1159_v44  ;;  %v119_v45 = vpop.permute.xlu0 %118 }
 0xb59   :  { %2839 = vmatpush3.bf16.msra.mxu1 %v3229_v34  ;;  %2656 = vmatprep.mubr.msk.f32.mxu1 %vm3068_vm0, %v3069_v1  ;;  %v146_v50 = vmul.f32 %v3211_v13, %v119_v45 }
 0xb5a   :  { %2840 = vmatprep.subr.bf16.mxu1 %v3067_v0 }
 0xb5b   :  { %v160_v51 = vadd.f32 %v3217_v15, %v146_v50 }
 0xb5d   :  { %2842 = vmatpush3.bf16.msra.mxu1 %v3232_v36 }
 0xb5e   :  { %2849 = vmatprep.subr.bf16.mxu1 %v3067_v0 }
 0xc23   :  { %v1228_v46 = vpop.f32.mrb[6].mxu1 }
 0xc24   :  { %v2894_v48 = vadd.f32 %v3282_v47, %v1228_v46  ;;  %v2614_v49 = vpop.f32.mrb[7].mxu1 }
 0xc26   :  { %2956 = vtanh.f32 %v2894_v48 }
 0xc2b   :  { %v1399_v52 = vpop.f32.mrb[8].mxu1 }
 0xc2c   :  { %v1400_v53 = vadd.f32 %v1399_v52, %v160_v51  ;;  %v2636_v54 = vpop.f32.mrb[9].mxu1 }
 0xc2e   :  { %2958 = vtanh.f32 %v1400_v53 }
 0xc30   :  { %v2957_v55 = vpop.eup %2956 }
 0xc31   :  { %1238 = vrot.lane.b32.xlu1 %v2957_v55, %s3072_s16  ;;  %v1234_v57 = vmul.f32 0.5, %v2957_v55 }
 0xc33   :  { %v1235_v58 = vadd.f32 0.5, %v1234_v57 }
 0xc35   :  { %v1236_v3 = vmul.f32 %v1235_v58, %v3386_v28 }
 0xc38   :  { %v2959_v56 = vpop.eup %2958 }
 0xc39   :  { %1408 = vrot.lane.b32.xlu0 %v2959_v56, %s3072_s16  ;;  %v1404_v61 = vmul.f32 0.5, %v2959_v56  ;;  %v94_v56 = vld [vmem:[%s3584_s0 + $0x30] sm:$0xff] }
 0xc3b   :  { %v1405_v62 = vadd.f32 0.5, %v1404_v61 }
 0xc3d   :  { %v1406_v7 = vmul.f32 %v1405_v62, %v3390_v31 }
 0xca3   :  { %v1239_v59 = vpop.permute.xlu1 %1238 }
 0xca4   :  { %v1241_v60 = vmul.f32 %v1239_v59, %v1235_v58 }
 0xca6   :  { %1243 = vrot.lane.b32.xlu1 %v1241_v60, %s3071_s2 }
 0xcab   :  { %v1409_v63 = vpop.permute.xlu0 %1408 }
 0xcac   :  { %v1411_v2 = vmul.f32 %v1409_v63, %v1405_v62 }
 0xcae   :  { %1413 = vrot.lane.b32.xlu0 %v1411_v2, %s3071_s2 }
 0xd18   :  { %v1244_v4 = vpop.permute.xlu1 %1243 }
 0xd19   :  { %v3433_v5 = vadd.f32 %v1244_v4, %v1236_v3 }
 0xd1b   :  { %2960 = vtanh.f32 %v3433_v5 }
 0xd20   :  { %v1414_v8 = vpop.permute.xlu0 %1413 }
 0xd21   :  { %v3437_v9 = vadd.f32 %v1414_v8, %v1406_v7 }
 0xd23   :  { %2962 = vtanh.f32 %v3437_v9 }
 0xd25   :  { %v2961_v11 = vpop.eup %2960 }
 0xd26   :  { %1249 = vrot.lane.b32.xlu1 %v2961_v11, %s3072_s16 }
 0xd2d   :  { %v2963_v12 = vpop.eup %2962 }
 0xd2e   :  { %1419 = vrot.lane.b32.xlu0 %v2963_v12, %s3072_s16 }
 0xd98   :  { %v1250_v14 = vpop.permute.xlu1 %1249 }
 0xd99   :  { %v1252_v16 = vmul.f32 %v1250_v14, %v1235_v58 }
 0xd9b   :  { %1254 = vrot.lane.b32.xlu1 %v1252_v16, %s3071_s2 }
 0xd9f   :  { %123 = vperm.xlu1 %2927, %v93_v17  }
 0xda0   :  { %v1420_v18 = vpop.permute.xlu0 %1419 }
 0xda1   :  { %v1422_v19 = vmul.f32 %v1420_v18, %v1405_v62 }
 0xda3   :  { %1424 = vrot.lane.b32.xlu0 %v1422_v19, %s3071_s2 }
 0xe0d   :  { %v1255_v20 = vpop.permute.xlu1 %1254 }
 0xe0e   :  { %2346 = vst.msk [vmem:[%s3593_s9 + $0x18] sm:$0xff] %vm185_vm1, %v1255_v20  ;;  %2624 = vmatmul.mubr.msk.f32.vlgmr.msra.gmra.mrb[8].mxu0 %vm185_vm1, %v1255_v20 }
 0xe0f   :  { %2833 = vmatpush3.bf16.msra.mxu0 %v3244_v40  ;;  %2645 = vmatprep.mubr.msk.f32.mxu0 %vm3068_vm0, %v3069_v1 }
 0xe10   :  { %2834 = vmatprep.subr.bf16.mxu0 %v3067_v0 }
 0xe13   :  { %2836 = vmatpush3.bf16.msra.mxu0 %v3257_v43 }
 0xe14   :  { %2843 = vmatprep.subr.bf16.mxu0 %v3067_v0 }
 0xe15   :  { %v1425_v21 = vpop.permute.xlu0 %1424 }
 0xe16   :  { %2646 = vmatmul.mubr.msk.f32.vlgmr.msra.gmra.mrb[8].mxu0 %vm185_vm1, %v1425_v21 }
 0xe17   :  { %2845 = vmatpush3.bf16.msra.mxu0 %v3190_v6  ;;  %2667 = vmatprep.mubr.msk.f32.mxu0 %vm3068_vm0, %v3069_v1 }
 0xe18   :  { %2846 = vmatprep.subr.bf16.mxu0 %v3067_v0 }
 0xe1b   :  { %2848 = vmatpush3.bf16.msra.mxu0 %v3199_v10 }
 0xe1c   :  { %2855 = vmatprep.subr.bf16.mxu0 %v3067_v0 }
 0xe1e   :  { %2668 = vmatmul.mubr.msk.f32.vlgmr.msra.gmra.mrb[10].mxu0 %vm185_vm1, %v1425_v21  ;;  %v124_v22 = vpop.permute.xlu1 %123 }
 0xe1f   :  { %2857 = vmatpush3.bf16.msra.mxu0 %v3229_v34  ;;  %2689 = vmatprep.mubr.msk.f32.mxu0 %vm3068_vm0, %v3069_v1  ;;  %v147_v26 = vmul.f32 %v3211_v13, %v124_v22 }
 0xe20   :  { %2858 = vmatprep.subr.bf16.mxu0 %v3067_v0 }
 0xe21   :  { %v161_v27 = vadd.f32 %v3217_v15, %v147_v26 }
 0xe23   :  { %2860 = vmatpush3.bf16.msra.mxu0 %v3232_v36 }
 0xe24   :  { %2867 = vmatprep.subr.bf16.mxu0 %v3067_v0 }
 0xee9   :  { %v1494_v23 = vpop.f32.mrb[8].mxu0 }
 0xeea   :  { %v2895_v24 = vadd.f32 %v3282_v47, %v1494_v23  ;;  %v2647_v25 = vpop.f32.mrb[9].mxu0 }
 0xeec   :  { %2964 = vtanh.f32 %v2895_v24 }
 0xef1   :  { %v1665_v28 = vpop.f32.mrb[10].mxu0 }
 0xef2   :  { %v1666_v29 = vadd.f32 %v1665_v28, %v161_v27  ;;  %v2669_v30 = vpop.f32.mrb[11].mxu0 }
 0xef3   :  { %v95_v30 = vld [vmem:[%s3584_s0 + $0x38] sm:$0xff] }
 0xef4   :  { %2966 = vtanh.f32 %v1666_v29 }
 0xef6   :  { %v2965_v31 = vpop.eup %2964 }
 0xef7   :  { %1504 = vrot.lane.b32.xlu0 %v2965_v31, %s3072_s16  ;;  %v1500_v33 = vmul.f32 0.5, %v2965_v31 }
 0xef9   :  { %v1501_v35 = vadd.f32 0.5, %v1500_v33 }
 0xefb   :  { %v1502_v45 = vmul.f32 %v1501_v35, %v3433_v5 }
 0xefe   :  { %v2967_v32 = vpop.eup %2966 }
 0xeff   :  { %1674 = vrot.lane.b32.xlu1 %v2967_v32, %s3072_s16  ;;  %v1670_v39 = vmul.f32 0.5, %v2967_v32 }
 0xf01   :  { %v1671_v41 = vadd.f32 0.5, %v1670_v39 }
 0xf03   :  { %v1672_v49 = vmul.f32 %v1671_v41, %v3437_v9 }
 0xf69   :  { %v1505_v37 = vpop.permute.xlu0 %1504 }
 0xf6a   :  { %v1507_v38 = vmul.f32 %v1505_v37, %v1501_v35 }
 0xf6c   :  { %1509 = vrot.lane.b32.xlu0 %v1507_v38, %s3071_s2 }
 0xf71   :  { %v1675_v42 = vpop.permute.xlu1 %1674 }
 0xf72   :  { %v1677_v44 = vmul.f32 %v1675_v42, %v1671_v41 }
 0xf74   :  { %1679 = vrot.lane.b32.xlu1 %v1677_v44, %s3071_s2 }
 0xfde   :  { %v1510_v46 = vpop.permute.xlu0 %1509 }
 0xfdf   :  { %v3480_v48 = vadd.f32 %v1510_v46, %v1502_v45 }
 0xfe1   :  { %2968 = vtanh.f32 %v3480_v48 }
 0xfe6   :  { %v1680_v50 = vpop.permute.xlu1 %1679 }
 0xfe7   :  { %v3484_v51 = vadd.f32 %v1680_v50, %v1672_v49 }
 0xfe9   :  { %2970 = vtanh.f32 %v3484_v51 }
 0xfeb   :  { %v2969_v52 = vpop.eup %2968 }
 0xfec   :  { %1515 = vrot.lane.b32.xlu0 %v2969_v52, %s3072_s16 }
 0xff3   :  { %v2971_v53 = vpop.eup %2970 }
 0xff4   :  { %1685 = vrot.lane.b32.xlu1 %v2971_v53, %s3072_s16 }
0x105e   :  { %v1516_v54 = vpop.permute.xlu0 %1515 }
0x105f   :  { %v1518_v55 = vmul.f32 %v1516_v54, %v1501_v35 }
0x1061   :  { %1520 = vrot.lane.b32.xlu0 %v1518_v55, %s3071_s2 }
0x1065   :  { %128 = vperm.xlu0 %2926, %v94_v56  }
0x1066   :  { %v1686_v57 = vpop.permute.xlu1 %1685 }
0x1067   :  { %v1688_v58 = vmul.f32 %v1686_v57, %v1671_v41 }
0x1069   :  { %1690 = vrot.lane.b32.xlu1 %v1688_v58, %s3071_s2 }
0x10d3   :  { %v1521_v59 = vpop.permute.xlu0 %1520 }
0x10d4   :  { %2350 = vst.msk [vmem:[%s3593_s9 + $0x20] sm:$0xff] %vm185_vm1, %v1521_v59  ;;  %2657 = vmatmul.mubr.msk.f32.vlgmr.msra.gmra.mrb[10].mxu1 %vm185_vm1, %v1521_v59 }
0x10d5   :  { %2851 = vmatpush3.bf16.msra.mxu1 %v3244_v40  ;;  %2678 = vmatprep.mubr.msk.f32.mxu1 %vm3068_vm0, %v3069_v1 }
0x10d6   :  { %2852 = vmatprep.subr.bf16.mxu1 %v3067_v0 }
0x10d9   :  { %2854 = vmatpush3.bf16.msra.mxu1 %v3257_v43 }
0x10da   :  { %2861 = vmatprep.subr.bf16.mxu1 %v3067_v0 }
0x10db   :  { %v1691_v60 = vpop.permute.xlu1 %1690 }
0x10dc   :  { %2679 = vmatmul.mubr.msk.f32.vlgmr.msra.gmra.mrb[10].mxu1 %vm185_vm1, %v1691_v60 }
0x10dd   :  { %2863 = vmatpush3.bf16.msra.mxu1 %v3190_v6  ;;  %2700 = vmatprep.mubr.msk.f32.mxu1 %vm3068_vm0, %v3069_v1 }
0x10de   :  { %2864 = vmatprep.subr.bf16.mxu1 %v3067_v0 }
0x10e1   :  { %2866 = vmatpush3.bf16.msra.mxu1 %v3199_v10 }
0x10e2   :  { %2873 = vmatprep.subr.bf16.mxu1 %v3067_v0 }
0x10e4   :  { %2701 = vmatmul.mubr.msk.f32.vlgmr.msra.gmra.mrb[12].mxu1 %vm185_vm1, %v1691_v60  ;;  %v129_v61 = vpop.permute.xlu0 %128 }
0x10e5   :  { %2875 = vmatpush3.bf16.msra.mxu1 %v3229_v34  ;;  %2722 = vmatprep.mubr.msk.f32.mxu1 %vm3068_vm0, %v3069_v1  ;;  %v148_v3 = vmul.f32 %v3211_v13, %v129_v61 }
0x10e6   :  { %2876 = vmatprep.subr.bf16.mxu1 %v3067_v0 }
0x10e7   :  { %v162_v4 = vadd.f32 %v3217_v15, %v148_v3 }
0x10e9   :  { %2878 = vmatpush3.bf16.msra.mxu1 %v3232_v36 }
0x10ea   :  { %2885 = vmatprep.subr.bf16.mxu1 %v3067_v0 }
0x11af   :  { %v1760_v62 = vpop.f32.mrb[10].mxu1 }
0x11b0   :  { %v2896_v63 = vadd.f32 %v3282_v47, %v1760_v62  ;;  %v2680_v2 = vpop.f32.mrb[11].mxu1 }
0x11b2   :  { %2972 = vtanh.f32 %v2896_v63 }
0x11b7   :  { %v1931_v34 = vpop.f32.mrb[12].mxu1 }
0x11b8   :  { %v1932_v5 = vadd.f32 %v1931_v34, %v162_v4  ;;  %v2702_v7 = vpop.f32.mrb[13].mxu1 }
0x11ba   :  { %2974 = vtanh.f32 %v1932_v5 }
0x11bc   :  { %v2973_v8 = vpop.eup %2972 }
0x11bd   :  { %1770 = vrot.lane.b32.xlu1 %v2973_v8, %s3072_s16  ;;  %v1766_v9 = vmul.f32 0.5, %v2973_v8 }
0x11bf   :  { %v1767_v11 = vadd.f32 0.5, %v1766_v9 }
0x11c1   :  { %v1768_v20 = vmul.f32 %v1767_v11, %v3480_v48 }
0x11c4   :  { %v2975_v36 = vpop.eup %2974 }
0x11c5   :  { %1940 = vrot.lane.b32.xlu0 %v2975_v36, %s3072_s16  ;;  %v1936_v16 = vmul.f32 0.5, %v2975_v36 }
0x11c7   :  { %v1937_v17 = vadd.f32 0.5, %v1936_v16 }
0x11c9   :  { %v1938_v23 = vmul.f32 %v1937_v17, %v3484_v51 }
0x122f   :  { %v1771_v12 = vpop.permute.xlu1 %1770 }
0x1230   :  { %v1773_v14 = vmul.f32 %v1771_v12, %v1767_v11 }
0x1232   :  { %1775 = vrot.lane.b32.xlu1 %v1773_v14, %s3071_s2 }
0x1237   :  { %v1941_v18 = vpop.permute.xlu0 %1940 }
0x1238   :  { %v1943_v19 = vmul.f32 %v1941_v18, %v1937_v17 }
0x123a   :  { %1945 = vrot.lane.b32.xlu0 %v1943_v19, %s3071_s2 }
0x12a4   :  { %v1776_v21 = vpop.permute.xlu1 %1775 }
0x12a5   :  { %v1778_v22 = vadd.f32 %v1776_v21, %v1768_v20 }
0x12a7   :  { %2976 = vtanh.f32 %v1778_v22 }
0x12ac   :  { %v1946_v24 = vpop.permute.xlu0 %1945 }
0x12ad   :  { %v1948_v25 = vadd.f32 %v1946_v24, %v1938_v23 }
0x12af   :  { %2978 = vtanh.f32 %v1948_v25 }
0x12b1   :  { %v2977_v26 = vpop.eup %2976 }
0x12b2   :  { %1781 = vrot.lane.b32.xlu1 %v2977_v26, %s3072_s16 }
0x12b9   :  { %v2979_v27 = vpop.eup %2978 }
0x12ba   :  { %1951 = vrot.lane.b32.xlu0 %v2979_v27, %s3072_s16 }
0x1324   :  { %v1782_v28 = vpop.permute.xlu1 %1781 }
0x1325   :  { %v1784_v29 = vmul.f32 %v1782_v28, %v1767_v11 }
0x1327   :  { %1786 = vrot.lane.b32.xlu1 %v1784_v29, %s3071_s2 }
0x132b   :  { %133 = vperm.xlu1 %2927, %v95_v30  }
0x132c   :  { %v1952_v31 = vpop.permute.xlu0 %1951 }
0x132d   :  { %v1954_v32 = vmul.f32 %v1952_v31, %v1937_v17 }
0x132f   :  { %1956 = vrot.lane.b32.xlu0 %v1954_v32, %s3071_s2 }
0x1399   :  { %v1787_v33 = vpop.permute.xlu1 %1786 }
0x139a   :  { %2354 = vst.msk [vmem:[%s3593_s9 + $0x28] sm:$0xff] %vm185_vm1, %v1787_v33  ;;  %2690 = vmatmul.mubr.msk.f32.vlgmr.msra.gmra.mrb[12].mxu0 %vm185_vm1, %v1787_v33 }
0x139b   :  { %2869 = vmatpush3.bf16.msra.mxu0 %v3244_v40  ;;  %2711 = vmatprep.mubr.msk.f32.mxu0 %vm3068_vm0, %v3069_v1 }
0x139c   :  { %2870 = vmatprep.subr.bf16.mxu0 %v3067_v0 }
0x139f   :  { %2872 = vmatpush3.bf16.msra.mxu0 %v3257_v43 }
0x13a0   :  { %2879 = vmatprep.subr.bf16.mxu0 %v3067_v0 }
0x13a1   :  { %v1957_v35 = vpop.permute.xlu0 %1956 }
0x13a2   :  { %2712 = vmatmul.mubr.msk.f32.vlgmr.msra.gmra.mrb[12].mxu0 %vm185_vm1, %v1957_v35 }
0x13a3   :  { %2881 = vmatpush3.bf16.msra.mxu0 %v3190_v6  ;;  %2733 = vmatprep.mubr.msk.f32.mxu0 %vm3068_vm0, %v3069_v1 }
0x13a4   :  { %2882 = vmatprep.subr.bf16.mxu0 %v3067_v0 }
0x13a7   :  { %2884 = vmatpush3.bf16.msra.mxu0 %v3199_v10 }
0x13aa   :  { %2734 = vmatmul.mubr.msk.f32.vlgmr.msra.gmra.mrb[14].mxu0 %vm185_vm1, %v1957_v35  ;;  %v134_v37 = vpop.permute.xlu1 %133 }
0x13ab   :  { %v149_v42 = vmul.f32 %v3211_v13, %v134_v37 }
0x13ad   :  { %v163_v44 = vadd.f32 %v3217_v15, %v149_v42 }
0x1475   :  { %v2026_v38 = vpop.f32.mrb[12].mxu0 }
0x1476   :  { %v2897_v39 = vadd.f32 %v3282_v47, %v2026_v38  ;;  %v2713_v41 = vpop.f32.mrb[13].mxu0 }
0x1478   :  { %2980 = vtanh.f32 %v2897_v39 }
0x147d   :  { %v2197_v6 = vpop.f32.mrb[14].mxu0 }
0x147e   :  { %v2198_v45 = vadd.f32 %v2197_v6, %v163_v44  ;;  %v2735_v46 = vpop.f32.mrb[15].mxu0 }
0x1480   :  { %2982 = vtanh.f32 %v2198_v45 }
0x1482   :  { %v2981_v48 = vpop.eup %2980 }
0x1483   :  { %2036 = vrot.lane.b32.xlu0 %v2981_v48, %s3072_s16  ;;  %v2032_v49 = vmul.f32 0.5, %v2981_v48 }
0x1485   :  { %v2033_v50 = vadd.f32 0.5, %v2032_v49 }
0x1487   :  { %v2034_v55 = vmul.f32 %v2033_v50, %v1778_v22 }
0x148a   :  { %v2983_v10 = vpop.eup %2982 }
0x148b   :  { %2206 = vrot.lane.b32.xlu1 %v2983_v10, %s3072_s16  ;;  %v2202_v13 = vmul.f32 0.5, %v2983_v10 }
0x148d   :  { %v2203_v53 = vadd.f32 0.5, %v2202_v13 }
0x148f   :  { %v2204_v58 = vmul.f32 %v2203_v53, %v1948_v25 }
0x14f5   :  { %v2037_v51 = vpop.permute.xlu0 %2036 }
0x14f6   :  { %v2039_v52 = vmul.f32 %v2037_v51, %v2033_v50 }
0x14f8   :  { %2041 = vrot.lane.b32.xlu0 %v2039_v52, %s3071_s2 }
0x14fd   :  { %v2207_v54 = vpop.permute.xlu1 %2206 }
0x14fe   :  { %v2209_v15 = vmul.f32 %v2207_v54, %v2203_v53 }
0x1500   :  { %2211 = vrot.lane.b32.xlu1 %v2209_v15, %s3071_s2 }
0x156a   :  { %v2042_v56 = vpop.permute.xlu0 %2041 }
0x156b   :  { %v2044_v57 = vadd.f32 %v2042_v56, %v2034_v55 }
0x156d   :  { %2984 = vtanh.f32 %v2044_v57 }
0x1572   :  { %v2212_v59 = vpop.permute.xlu1 %2211 }
0x1573   :  { %v2214_v60 = vadd.f32 %v2212_v59, %v2204_v58 }
0x1575   :  { %2986 = vtanh.f32 %v2214_v60 }
0x1577   :  { %v2985_v61 = vpop.eup %2984 }
0x1578   :  { %2047 = vrot.lane.b32.xlu0 %v2985_v61, %s3072_s16 }
0x157f   :  { %v2987_v62 = vpop.eup %2986 }
0x1580   :  { %2217 = vrot.lane.b32.xlu1 %v2987_v62, %s3072_s16 }
0x15ea   :  { %v2048_v63 = vpop.permute.xlu0 %2047 }
0x15eb   :  { %v2050_v2 = vmul.f32 %v2048_v63, %v2033_v50 }
0x15ed   :  { %2052 = vrot.lane.b32.xlu0 %v2050_v2, %s3071_s2 }
0x15f2   :  { %v2218_v3 = vpop.permute.xlu1 %2217 }
0x15f3   :  { %v2220_v4 = vmul.f32 %v2218_v3, %v2203_v53 }
0x15f5   :  { %2222 = vrot.lane.b32.xlu1 %v2220_v4, %s3071_s2 }
0x165f   :  { %v2053_v34 = vpop.permute.xlu0 %2052 }
0x1660   :  { %2358 = vst.msk [vmem:[%s3593_s9 + $0x30] sm:$0xff] %vm185_vm1, %v2053_v34  ;;  %2723 = vmatmul.mubr.msk.f32.vlgmr.msra.gmra.mrb[14].mxu1 %vm185_vm1, %v2053_v34 }
0x1661   :  { %2887 = vmatpush3.bf16.msra.mxu1 %v3244_v40  ;;  %2744 = vmatprep.mubr.msk.f32.mxu1 %vm3068_vm0, %v3069_v1 }
0x1662   :  { %2888 = vmatprep.subr.bf16.mxu1 %v3067_v0 }
0x1665   :  { %2890 = vmatpush3.bf16.msra.mxu1 %v3257_v43 }
0x1667   :  { %v2223_v5 = vpop.permute.xlu1 %2222 }
0x1668   :  { %2745 = vmatmul.mubr.msk.f32.vlgmr.msra.gmra.mrb[14].mxu1 %vm185_vm1, %v2223_v5 }
0x173b   :  { %v2292_v7 = vpop.f32.mrb[14].mxu1 }
0x173c   :  { %v2898_v8 = vadd.f32 %v3282_v47, %v2292_v7  ;;  %v2746_v36 = vpop.f32.mrb[15].mxu1 }
0x173e   :  { %2988 = vtanh.f32 %v2898_v8 }
0x1748   :  { %v2989_v9 = vpop.eup %2988 }
0x1749   :  { %2302 = vrot.lane.b32.xlu0 %v2989_v9, %s3072_s16  ;;  %v2298_v11 = vmul.f32 0.5, %v2989_v9 }
0x174b   :  { %v2299_v40 = vadd.f32 0.5, %v2298_v11 }
0x174d   :  { %v2300_v0 = vmul.f32 %v2299_v40, %v2044_v57 }
0x17bb   :  { %v2303_v12 = vpop.permute.xlu0 %2302 }
0x17bc   :  { %v2305_v14 = vmul.f32 %v2303_v12, %v2299_v40 }
0x17be   :  { %2307 = vrot.lane.b32.xlu1 %v2305_v14, %s3071_s2 }
0x1830   :  { %v2308_v1 = vpop.permute.xlu1 %2307 }
0x1831   :  { %v2310_v43 = vadd.f32 %v2308_v1, %v2300_v0 }
0x1833   :  { %2990 = vtanh.f32 %v2310_v43 }
0x183d   :  { %v2991_v16 = vpop.eup %2990 }
0x183e   :  { %2313 = vrot.lane.b32.xlu0 %v2991_v16, %s3072_s16 }
0x18b0   :  { %v2314_v17 = vpop.permute.xlu0 %2313 }
0x18b1   :  { %v2316_v47 = vmul.f32 %v2314_v17, %v2299_v40 }
0x18b3   :  { %2318 = vrot.lane.b32.xlu1 %v2316_v47, %s3071_s2 }
0x1925   :  { %v2319_v18 = vpop.permute.xlu1 %2318 }
0x1926   :  { %2362 = vst.msk [vmem:[%s3593_s9 + $0x38] sm:$0xff] %vm185_vm1, %v2319_v18 }
0x1927   :  { %2327 = vsyncpa [#allocation4], 1 }
0x1928   :  { %2328 = vsyncpa [#allocation6], 1 }

</bundles_post_ra>
